<compile_context>
chip_gen: v5e
topology: v5e:2x2
jax: 0.10.0
libtpu: 0.0.40
codegen_flags: <defaults>
</compile_context>

<pallas_src>
import functools

import jax
import jax.numpy as jnp
from jax.experimental import pallas as pl
from jax.experimental.pallas import tpu as pltpu

_NCORES = 2      # leading "parallel" grid axis: both TCs on v7x, no-op on v5e/v6e
_LANES = 128


def _sublane_multiple(dtype):
    itemsize = jnp.dtype(dtype).itemsize
    return {4: 8, 2: 16, 1: 32}.get(itemsize, 8)


def _mae_partial_kernel(o_ref, l_ref, out_ref, *, tiles_per_core, num_tiles,
                        tile_r, rows, mask_last):
    """Accumulates per-lane partial sums of |o - l| into this core's out block."""
    c = pl.program_id(0)              # core (parallel) axis
    i = pl.program_id(1)              # row-tile (reduction, "arbitrary") axis
    g = c * tiles_per_core + i        # global row-tile index

    @pl.when(i == 0)
    def _():
        out_ref[...] = jnp.zeros_like(out_ref)

    def _accumulate(apply_mask):
        o = o_ref[...].astype(jnp.float32)
        l = l_ref[...].astype(jnp.float32)
        err = jnp.abs(o - l)
        if apply_mask:
            # Only the last global tile can read rows past the array extent.
            base = (num_tiles - 1) * tile_r
            row_ids = base + jax.lax.broadcasted_iota(jnp.int32, err.shape, 0)
            err = jnp.where(row_ids < rows, err, 0.0)
        # Sublane reduce only; no cross-lane reduce / scalar RMW per step.
        out_ref[0:1, :] += jnp.sum(err, axis=0, keepdims=True)

    if mask_last:
        @pl.when(g < num_tiles - 1)
        def _():
            _accumulate(False)

        @pl.when(g == num_tiles - 1)
        def _():
            _accumulate(True)
    elif tiles_per_core * _NCORES == num_tiles:
        _accumulate(False)            # every (c, i) is a valid, full tile
    else:
        @pl.when(g < num_tiles)
        def _():
            _accumulate(False)


def loss_mae(outputs, labels, *, target_block_bytes=4 * 1024 * 1024,
             min_kernel_elements=1 << 18):
    assert outputs.shape == labels.shape
    n = 1
    for d in outputs.shape:
        n *= d

    # Tiny inputs: per-call fixed cost dwarfs the work; fused XLA reduce wins.
    if n < max(min_kernel_elements, _LANES):
        err = outputs.astype(jnp.float32) - labels.astype(jnp.float32)
        return jnp.mean(jnp.abs(err)).astype(outputs.dtype)

    o_flat = outputs.reshape(-1)
    l_flat = labels.reshape(-1)

    # Lane-dense 2D view. Prefer a column count that divides n exactly (no tail);
    # otherwise the sub-row remainder (< cols elements) is reduced in the wrapper
    # instead of materializing padded copies of both inputs.
    cols = None
    for c in (1024, 512, 256, 128):
        if n % c == 0:
            cols = c
            break
    if cols is None:
        cols = 1024 if n >= 1024 else _LANES
    rows = n // cols
    n_main = rows * cols

    sm = _sublane_multiple(outputs.dtype)
    itemsize = jnp.dtype(outputs.dtype).itemsize
    max_rows = max(sm, (target_block_bytes // (cols * itemsize)) // sm * sm)
    tile_r = rows if rows <= max_rows else max_rows

    num_tiles = -(-rows // tile_r)                # ceil
    mask_last = (rows % tile_r) != 0
    tiles_per_core = -(-num_tiles // _NCORES)     # ceil

    if n_main == n:
        o2 = o_flat.reshape(rows, cols)
        l2 = l_flat.reshape(rows, cols)
    else:
        o2 = o_flat[:n_main].reshape(rows, cols)
        l2 = l_flat[:n_main].reshape(rows, cols)

    if tiles_per_core * _NCORES == num_tiles:
        def in_index(c, i):
            return (c * tiles_per_core + i, 0)
    else:
        # Uneven split across cores: clamp the block index of the few invalid
        # (c, i) pairs to the last valid tile; their accumulation is skipped
        # inside the kernel via pl.when.
        def in_index(c, i):
            return (jnp.minimum(c * tiles_per_core + i, num_tiles - 1), 0)

    kernel = functools.partial(
        _mae_partial_kernel, tiles_per_core=tiles_per_core, num_tiles=num_tiles,
        tile_r=tile_r, rows=rows, mask_last=mask_last)

    partials = pl.pallas_call(
        kernel,
        out_shape=jax.ShapeDtypeStruct((_NCORES * 8, cols), jnp.float32),
        grid_spec=pltpu.PrefetchScalarGridSpec(
            num_scalar_prefetch=0,
            grid=(_NCORES, tiles_per_core),
            in_specs=[
                pl.BlockSpec((tile_r, cols), in_index),
                pl.BlockSpec((tile_r, cols), in_index),
            ],
            out_specs=pl.BlockSpec((8, cols), lambda c, i: (c, 0)),
        ),
        compiler_params=pltpu.CompilerParams(
            dimension_semantics=("parallel", "arbitrary"),
            vmem_limit_bytes=32 * 1024 * 1024),
        cost_estimate=pl.CostEstimate(
            flops=3 * n_main,
            transcendentals=0,
            bytes_accessed=2 * n_main * itemsize + _NCORES * 8 * cols * 4),
    )(o2, l2)

    total = jnp.sum(partials)                     # tiny (16, cols) f32 reduce
    if n_main != n:                               # sub-row tail (< cols elements)
        o_tail = o_flat[n_main:].astype(jnp.float32)
        l_tail = l_flat[n_main:].astype(jnp.float32)
        total = total + jnp.sum(jnp.abs(o_tail - l_tail))

    return (total / n).astype(outputs.dtype)


def _loss_mae_ref(outputs, labels):
    return jnp.mean(jnp.abs(outputs.astype(jnp.float32) - labels.astype(jnp.float32)))


if __name__ == "__main__":
    keys = jax.random.split(jax.random.PRNGKey(0), 10)

    # 1) Module-consistent small shape (batch=2, channels=4, 16x16): tiny-input
    #    fast path (fused XLA reduce).
    o = jax.random.normal(keys[0], (2, 4, 16, 16), dtype=jnp.float32)
    l = jax.random.normal(keys[1], (2, 4, 16, 16), dtype=jnp.float32)
    got = jax.block_until_ready(loss_mae(o, l))
    ref = _loss_mae_ref(o, l)
    assert jnp.allclose(got, ref, rtol=1e-6, atol=1e-6), (got, ref)

    # 2) Pallas kernel path, exact tiling (no tail, no mask).
    o = jax.random.normal(keys[2], (8, 4, 64, 64), dtype=jnp.float32)
    l = jax.random.normal(keys[3], (8, 4, 64, 64), dtype=jnp.float32)
    got = jax.block_until_ready(loss_mae(o, l, min_kernel_elements=0))
    ref = _loss_mae_ref(o, l)
    assert jnp.allclose(got, ref, rtol=1e-5, atol=1e-6), (got, ref)

    # 3) Multi-tile + ragged last row-tile + sub-row tail (small blocks force it).
    o = jax.random.normal(keys[4], (2, 4, 100, 113), dtype=jnp.float32)
    l = jax.random.normal(keys[5], (2, 4, 100, 113), dtype=jnp.float32)
    got = jax.block_until_ready(
        loss_mae(o, l, min_kernel_elements=0, target_block_bytes=64 * 1024))
    ref = _loss_mae_ref(o, l)
    assert jnp.allclose(got, ref, rtol=1e-5, atol=1e-6), (got, ref)

    # 4) Uneven tile split across the 2-core axis (clamped index_map path).
    o = jax.random.normal(keys[6], (2, 4, 100, 100), dtype=jnp.float32)
    l = jax.random.normal(keys[7], (2, 4, 100, 100), dtype=jnp.float32)
    got = jax.block_until_ready(
        loss_mae(o, l, min_kernel_elements=0, target_block_bytes=64 * 1024))
    ref = _loss_mae_ref(o, l)
    assert jnp.allclose(got, ref, rtol=1e-5, atol=1e-6), (got, ref)

    # 5) bf16 path (16-row native sublane tiling, in-kernel f32 accumulation).
    o = jax.random.normal(keys[8], (4, 8, 64, 64), dtype=jnp.bfloat16)
    l = jax.random.normal(keys[9], (4, 8, 64, 64), dtype=jnp.bfloat16)
    got = jax.block_until_ready(
        loss_mae(o, l, min_kernel_elements=0, target_block_bytes=64 * 1024))
    ref = _loss_mae_ref(o, l)
    assert jnp.allclose(got.astype(jnp.float32), ref, rtol=1e-2, atol=1e-3), (got, ref)

    print("KERNEL_OK")
</pallas_src>

<mosaic_0001>
module attributes {stable_mosaic.version = 11 : i64} {
  func.func @_mae_partial_kernel(%arg0: i32, %arg1: i32, %arg2: memref<128x1024xf32, #tpu.memory_space<vmem>>, %arg3: memref<128x1024xf32, #tpu.memory_space<vmem>>, %arg4: memref<8x1024xf32, #tpu.memory_space<vmem>>) attributes {dimension_semantics = [#tpu.dimension_semantics<parallel>, #tpu.dimension_semantics<arbitrary>], iteration_bounds = array<i64: 2, 1>, scalar_prefetch = 0 : i64, scratch_operands = 0 : i64, tpu.core_type = #tpu.core_type<tc>, window_params = [{transform_indices = @transform_0, window_bounds = array<i64: 128, 1024>}, {transform_indices = @transform_1, window_bounds = array<i64: 128, 1024>}, {transform_indices = @transform_2, window_bounds = array<i64: 8, 1024>}]} {
    %c1_i32 = arith.constant 1 : i32
    %0 = arith.muli %arg0, %c1_i32 : i32
    %1 = arith.addi %0, %arg1 : i32
    %c0_i32 = arith.constant 0 : i32
    %2 = arith.cmpi eq, %arg1, %c0_i32 : i32
    %3 = arith.extui %2 : i1 to i32
    %c0_i32_0 = arith.constant 0 : i32
    %4 = arith.cmpi ne, %3, %c0_i32_0 : i32
    scf.if %4 {
      %cst = arith.constant 0.000000e+00 : f32
      %8 = vector.broadcast %cst : f32 to vector<8x1024xf32>
      %c0 = arith.constant 0 : index
      %c0_3 = arith.constant 0 : index
      %9 = vector.load %arg4[%c0, %c0_3] : memref<8x1024xf32, #tpu.memory_space<vmem>>, vector<8x1024xf32>
      tpu.vector_store %arg4[%c0, %c0_3], %8 {strides = array<i32>} : memref<8x1024xf32, #tpu.memory_space<vmem>>, vector<8x1024xf32>,
    } else {
    }
    %c1_i32_1 = arith.constant 1 : i32
    %5 = arith.cmpi slt, %1, %c1_i32_1 : i32
    %6 = arith.extui %5 : i1 to i32
    %c0_i32_2 = arith.constant 0 : i32
    %7 = arith.cmpi ne, %6, %c0_i32_2 : i32
    scf.if %7 {
      %c0 = arith.constant 0 : index
      %c0_3 = arith.constant 0 : index
      %8 = vector.load %arg2[%c0, %c0_3] : memref<128x1024xf32, #tpu.memory_space<vmem>>, vector<128x1024xf32>
      %c0_4 = arith.constant 0 : index
      %c0_5 = arith.constant 0 : index
      %9 = vector.load %arg3[%c0_4, %c0_5] : memref<128x1024xf32, #tpu.memory_space<vmem>>, vector<128x1024xf32>
      %10 = arith.subf %8, %9 : vector<128x1024xf32>
      %11 = math.absf %10 : vector<128x1024xf32>
      %c0_6 = arith.constant 0 : index
      %c0_7 = arith.constant 0 : index
      %12 = vector.load %arg4[%c0_6, %c0_7] : memref<8x1024xf32, #tpu.memory_space<vmem>>, vector<1x1024xf32>
      %cst = arith.constant dense<0.000000e+00> : vector<1024xf32>
      %13 = vector.multi_reduction <add>, %11, %cst [0] : vector<128x1024xf32> to vector<1024xf32>
      %14 = vector.shape_cast %13 : vector<1024xf32> to vector<1x1024xf32>
      %15 = arith.addf %12, %14 : vector<1x1024xf32>
      %c0_8 = arith.constant 0 : index
      %c0_9 = arith.constant 0 : index
      %16 = vector.load %arg4[%c0_8, %c0_9] : memref<8x1024xf32, #tpu.memory_space<vmem>>, vector<1x1024xf32>
      tpu.vector_store %arg4[%c0_8, %c0_9], %15 {strides = array<i32>} : memref<8x1024xf32, #tpu.memory_space<vmem>>, vector<1x1024xf32>,
    } else {
    }
    return
  }
  func.func @transform_0(%arg0: i32, %arg1: i32) -> (i32, i32) {
    %c1_i32 = arith.constant 1 : i32
    %0 = arith.muli %arg0, %c1_i32 : i32
    %1 = arith.addi %0, %arg1 : i32
    %c0_i32 = arith.constant 0 : i32
    %2 = arith.minsi %1, %c0_i32 : i32
    %c0_i32_0 = arith.constant 0 : i32
    %c0_i32_1 = arith.constant 0 : i32
    return %2, %c0_i32_0 : i32, i32
  }
  func.func @transform_1(%arg0: i32, %arg1: i32) -> (i32, i32) {
    %c1_i32 = arith.constant 1 : i32
    %0 = arith.muli %arg0, %c1_i32 : i32
    %1 = arith.addi %0, %arg1 : i32
    %c0_i32 = arith.constant 0 : i32
    %2 = arith.minsi %1, %c0_i32 : i32
    %c0_i32_0 = arith.constant 0 : i32
    %c0_i32_1 = arith.constant 0 : i32
    return %2, %c0_i32_0 : i32, i32
  }
  func.func @transform_2(%arg0: i32, %arg1: i32) -> (i32, i32) {
    %c0_i32 = arith.constant 0 : i32
    %c0_i32_0 = arith.constant 0 : i32
    return %arg0, %c0_i32 : i32, i32
  }
}

</mosaic_0001>

<bundles_post_ra>
// kernel: tpu_custom_call.1
= control target key start
LH: loop header
LB: loop body
LE: loop exit
PB: predicated region body
PF: predicated region fallthrough
CT: control target
= control target key end

     0   :  { %7 = vsyncpa [#allocation3], 0  ;;  %s3262_s0 = inlined_call_operand.hbm [shape: f32[128,1024], index: 0, kind: input, shape index: {}]   ;;  %s3263_s1 = inlined_call_operand.hbm [shape: f32[128,1024], index: 1, kind: input, shape index: {}]   ;;  %s3264_s2 = inlined_call_operand.hbm [shape: f32[16,1024], index: 2, kind: output, shape index: {}]  }
   0x1   :  { %9 = vsyncpa [#allocation3 + $0x1], 0 }
   0x2   :  { %10 = vsyncpa [#allocation6], 0 }
   0x3   :  { %12 = vsyncpa [#allocation6 + $0x1], 0 }
   0x4   :  { %13 = vsyncpa [#allocation4], 0 }
   0x5   :  { %15 = vsyncpa [#allocation4 + $0x1], 0  ;;  %s1407_s9 = smov 0   ;;  %s1409_s10 = smov 0  }
   0x6   :  { %s1411_s11 = smov 0   ;;  %s1413_s12 = smov 0  }
   0x7   :  { %s1415_s13 = smov 0   ;;  %s1417_s14 = smov 0  }
   0x8   :  { %s1419_s15 = smov 0   ;;  %s1421_s16 = smov 0  }
   0x9 LB: > { %s1097_s17 = sadd.s32 4294967295, %s1385_s16   ;;  %s1098_s18 = sadd.s32 4294967294, %s1385_s16   ;;  %s1385_s16 = sphi %s1421_s16, %s21_s16   ;;  %s1381_s15 = sphi %s1419_s15, %s4026_s15   ;;  %s1377_s14 = sphi %s1417_s14, %s4025_s14   ;;  %s1373_s13 = sphi %s1415_s13, %s3252_s13   ;;  %s1369_s12 = sphi %s1413_s12, %s4024_s12   ;;  %s1365_s11 = sphi %s1411_s11, %s4023_s11   ;;  %s1361_s10 = sphi %s1409_s10, %s4022_s10   ;;  %s1357_s9 = sphi %s1407_s9, %s4021_s9  }
   0xa   : > { %s33_s19 = sadd.s32 1, %s1381_s15  ;;  %p1354_p1 = scmp.ne.s32.totalorder %s1373_s13, 0 }
   0xb   : > { %p35_p0 = scmp.ge.s32.totalorder %s33_s19, 2  ;;  %p54_p2 = scmp.eq.s32.totalorder %s1385_s16, 0 }
   0xc   : > { %p59_p3 = scmp.ne.s32.totalorder %s1373_s13, %s1369_s12  ;;  %p60_p5 = scmp.eq.s32.totalorder %s1097_s17, 0 }
   0xd   : > { %s4028_s19 = smov (%p35_p0, %s33_s19), 0  ;;  %p1453_p4 = por %p1354_p1, %p54_p2 }
   0xe   : > { %p1457_p6 = por %p60_p5, %p59_p3  ;;  %s101_s22 = ssub.s32 %s1381_s15, %s4028_s19 }
   0xf   : > { %p102_p7 = scmp.eq.s32.totalorder %s101_s22, 0  ;;  %s104_s23 = sadd.s32 1, %s1365_s11 }
  0x10   : > { %p114_p8 = scmp.ne.s32.totalorder %s1365_s11, %s1361_s10  ;;  %p115_p9 = scmp.eq.s32.totalorder %s1097_s17, 1 }
  0x11   : > { %s1465_s24 = scalar_select %p102_p7, %s1365_s11, %s104_s23  }
  0x12   : > { %p120_p10 = scmp.ne.s32.totalorder %s1361_s10, %s1357_s9  ;;  %p121_p11 = scmp.eq.s32.totalorder %s1098_s18, 1 }
  0x13   : > { %p1471_p12 = por %p115_p9, %p114_p8  ;;  %p1100_p13 = scmp.ge.s32.totalorder %s1385_s16, 2 }
  0x14   : > { %p1476_p0 = por %p121_p11, %p120_p10  ;;  %p1141_p1 = scmp.lt.s32.totalorder %s1385_s16, 2 }
  0x15   : > { %s155_s29 = sshll.u32 %s3262_s0, 4  ;;  %s1387_s30 = smov [#allocation2]   ;;  %s156_s29 = int_to_ptr.hbm [resolvable:$true] %s155_s29 }
  0x16   : > { %s157_s3 = sshll.u32 %s1387_s30, 4  ;;  %p1486_p2 = pnand %p1141_p1, %p1453_p4  ;;  %s158_s3 = int_to_ptr.vmem [resolvable:$true] %s157_s3 }
  0x17   : > { %p1109_p3 = scmp.ge.s32.totalorder %s1385_s16, 1  ;;  %p191_p5 = scmp.lt.s32.totalorder %s1385_s16, 3 }
  0x18   : > { %s1218_s5 = sshra.s32 %s156_s29, 4  ;;  %p1222_p8 = pneg %p1486_p2  ;;  %s1219_s5 = int_to_ptr.hbm [resolvable:$true] %s1218_s5 }
  0x19   : > { %s1220_s6 = scalar_lea.hbm %s1219_s5, 1024  ;;  %s1225_s12 = scalar_lea.hbm %s3262_s0, 1024 }
  0x1a   : > { %p1221_p7 = scmp.ne.s32.totalorder %s1219_s5, %s1220_s6  ;;  %p1227_p4 = scmp.lt.s32.totalorder %s1225_s12, %s1220_s6 }
  0x1c   : > { %p1223_p9 = pnand %p1222_p8, %p1221_p7 }
  0x1e   : > { %p1224_p10 = pneg %p1223_p9 }
  0x20   : > { %p1229_p11 = pnand %p1227_p4, %p1224_p10 }
  0x22   : > { %1232 = shalt.err (!%p1229_p11)
}
  0x23   : > { %s1388_s17 = smov 1024   ;;  %s1389_s18 = smov 64  }
  0x24   : > { %1133 = dma.hbm_to_vmem [thread:$0]  (!%p1486_p2), %s156_s29, 16384, %s158_s3, [#allocation3], %s1388_s17, %s1388_s17, %s1389_s18  }
  0x25   : > { %p1506_p1 = pnand %p1109_p3, %p191_p5  ;;  %s181_s27 = sshll.u32 %s3263_s1, 4  ;;  %s182_s27 = int_to_ptr.hbm [resolvable:$true] %s181_s27 }
  0x26   : > { %s1390_s28 = smov [#allocation5]   ;;  %s1248_s5 = sshra.s32 %s182_s27, 4  ;;  %s1249_s5 = int_to_ptr.hbm [resolvable:$true] %s1248_s5 }
  0x27   : > { %s183_s30 = sshll.u32 %s1390_s28, 4  ;;  %s1250_s6 = scalar_lea.hbm %s1249_s5, 1024  ;;  %s184_s30 = int_to_ptr.vmem [resolvable:$true] %s183_s30 }
  0x28   : > { %p1251_p7 = scmp.ne.s32.totalorder %s1249_s5, %s1250_s6  ;;  %s1255_s7 = scalar_lea.hbm %s3263_s1, 1024 }
  0x29   : > { %p1257_p3 = scmp.lt.s32.totalorder %s1255_s7, %s1250_s6 }
  0x2a   : > { %p1253_p9 = pnand %p1251_p7, %p1222_p8 }
  0x2c   : > { %p1254_p10 = pneg %p1253_p9 }
  0x2e   : > { %p1259_p5 = pnand %p1257_p3, %p1254_p10 }
  0x30   : > { %1262 = shalt.err (!%p1259_p5)
}
  0x31   : > { %1136 = dma.hbm_to_vmem [thread:$0]  (!%p1486_p2), %s182_s27, 16384, %s184_s30, [#allocation6], %s1388_s17, %s1388_s17, %s1389_s18  }
  0x32   : > { %195 = sbr.rel (%p1506_p1) target bundleno = 393 (0x189), region = 28  ;;  %s197_s8 = sand.u32 (!%p1506_p1), 1, %s1373_s13  }
  0x33   : > { %s1110_s12 = sshll.u32 (!%p1506_p1), %s197_s8, 10  ;;  %s198_s22 = scalar_lea.sflag (!%p1506_p1), [#allocation3], %s197_s8 }
  0x34   : > { %s1524_s23 = scalar_lea.vmem (!%p1506_p1), [#allocation2], %s1110_s12 }
  0x37   : > { %1343 = dma.done.wait (%p1457_p6), %s198_s22, 16384  }
  0x38   : > { %1345 = vsyncadd (%p1457_p6), %s198_s22, 4294950912  ;;  %s208_s28 = scalar_lea.sflag [#allocation6], %s197_s8  ;;  %s1530_s5 = scalar_lea.vmem [#allocation5], %s1110_s12 }
  0x39   : > { %1347 = dma.done.wait (%p1457_p6), %s208_s28, 16384  }
  0x3a   : > { %1349 = vsyncadd (%p1457_p6), %s208_s28, 4294950912  ;;  %s235_s4 = sand.u32 1, %s1361_s10   ;;  %v1391_v0 = vmov 0.0   ;;  %p1113_p6 = scmp.ge.s32.totalorder %s1377_s14, 1 }
  0x3b   : > { %s1112_s17 = sshll.u32 %s235_s4, 6 }
  0x3c   : > { %s1539_s18 = scalar_lea.vmem [#allocation7], %s1112_s17 }
  0x3d   : > { %251 = vst [vmem:[%s1539_s18] sm:$0xff] %v1391_v0 }
  0x3e   : > { %252 = vst [vmem:[%s1539_s18 + $0x8] sm:$0xff] %v1391_v0 }
  0x3f   : > { %253 = vst [vmem:[%s1539_s18 + $0x10] sm:$0xff] %v1391_v0 }
  0x40   : > { %254 = vst [vmem:[%s1539_s18 + $0x18] sm:$0xff] %v1391_v0  ;;  %262 = sbr.rel (%p1113_p6) target bundleno = 378 (0x17a), region = 44 }
  0x41   : > { %255 = vst [vmem:[%s1539_s18 + $0x20] sm:$0xff] %v1391_v0 }
  0x42   : > { %256 = vst [vmem:[%s1539_s18 + $0x28] sm:$0xff] %v1391_v0 }
  0x43   : > { %257 = vst [vmem:[%s1539_s18 + $0x30] sm:$0xff] %v1391_v0 }
  0x44   : > { %258 = vst [vmem:[%s1539_s18 + $0x38] sm:$0xff] %v1391_v0 }
  0x45   : > { %v263_v1 = vld [vmem:[%s1524_s23] sm:$0xff]  ;;  %v264_v2 = vld [vmem:[%s1524_s23 + $0x8] sm:$0xff]  ;;  %v1553_v3 = vld [vmem:[%s1524_s23 + $0x10] sm:$0xff]  ;;  %vm961_vm0 = vcmask 1040384   ;;  %vm963_vm1 = vcmask 1042434   ;;  %vm967_vm2 = vcmask 1044484  }
  0x46   : > { %v391_v4 = vld [vmem:[%s1530_s5] sm:$0xff]  ;;  %v1557_v5 = vld [vmem:[%s1524_s23 + $0x18] sm:$0xff]  ;;  %v392_v7 = vld [vmem:[%s1530_s5 + $0x8] sm:$0xff]  ;;  %vm965_vm3 = vcmask 1041408   ;;  %vm969_vm4 = vcmask 1046534   ;;  %vm971_vm5 = vcmask 1045508  }
  0x47   : > { %v1560_v6 = vld [vmem:[%s1524_s23 + $0x20] sm:$0xff]  ;;  %v1564_v8 = vld [vmem:[%s1524_s23 + $0x28] sm:$0xff]  ;;  %v1567_v9 = vld [vmem:[%s1524_s23 + $0x30] sm:$0xff]  ;;  %v519_v17 = vsub.f32 %v263_v1, %v391_v4  ;;  %v520_v24 = vsub.f32 %v264_v2, %v392_v7  ;;  %vm973_vm6 = vcmask 1043456  }
  0x48   : > { %v1570_v10 = vld [vmem:[%s1524_s23 + $0x38] sm:$0xff]  ;;  %v393_v11 = vld [vmem:[%s1530_s5 + $0x10] sm:$0xff]  ;;  %v1574_v12 = vld [vmem:[%s1524_s23 + $0x40] sm:$0xff] }
  0x49   : > { %v1577_v13 = vld [vmem:[%s1524_s23 + $0x48] sm:$0xff]  ;;  %v1580_v14 = vld [vmem:[%s1524_s23 + $0x50] sm:$0xff]  ;;  %v1583_v15 = vld [vmem:[%s1530_s5 + $0x18] sm:$0xff]  ;;  %v521_v31 = vsub.f32 %v1553_v3, %v393_v11  ;;  %v1671_v49 = vand.u32 2147483647, %v519_v17 }
  0x4a   : > { %v1586_v16 = vld [vmem:[%s1530_s5 + $0x20] sm:$0xff]  ;;  %v1589_v18 = vld [vmem:[%s1524_s23 + $0x58] sm:$0xff]  ;;  %v1595_v20 = vld [vmem:[%s1524_s23 + $0x68] sm:$0xff]  ;;  %v522_v38 = vsub.f32 %v1557_v5, %v1583_v15  ;;  %v1697_v59 = vand.u32 2147483647, %v520_v24 }
  0x4b   : > { %v1592_v19 = vld [vmem:[%s1524_s23 + $0x60] sm:$0xff]  ;;  %v1598_v21 = vld [vmem:[%s1530_s5 + $0x28] sm:$0xff]  ;;  %v1601_v22 = vld [vmem:[%s1530_s5 + $0x30] sm:$0xff]  ;;  %v523_v39 = vsub.f32 %v1560_v6, %v1586_v16  ;;  %3439 = vst [vmem:[#allocation14_spill] sm:$0xff] %v1671_v49  ;;  %v1723_v5 = vand.u32 2147483647, %v521_v31 }
  0x4c   : > { %v1604_v23 = vld [vmem:[%s1530_s5 + $0x38] sm:$0xff]  ;;  %v1607_v25 = vld [vmem:[%s1524_s23 + $0x70] sm:$0xff]  ;;  %v1613_v27 = vld [vmem:[%s1524_s23 + $0x80] sm:$0xff]  ;;  %v524_v46 = vsub.f32 %v1564_v8, %v1598_v21  ;;  %v525_v47 = vsub.f32 %v1567_v9, %v1601_v22  ;;  %3443 = vst [vmem:[#allocation18_spill] sm:$0xff] %v1697_v59  ;;  %v1749_v22 = vand.u32 2147483647, %v522_v38 }
  0x4d   : > { %v1610_v26 = vld [vmem:[%s1524_s23 + $0x78] sm:$0xff]  ;;  %v1616_v28 = vld [vmem:[%s1530_s5 + $0x40] sm:$0xff]  ;;  %v1619_v29 = vld [vmem:[%s1530_s5 + $0x48] sm:$0xff]  ;;  %3448 = vst [vmem:[#allocation23_spill] sm:$0xff] %v1723_v5  ;;  %v1775_v58 = vand.u32 2147483647, %v523_v39 }
  0x4e   : > { %v1622_v30 = vld [vmem:[%s1530_s5 + $0x50] sm:$0xff]  ;;  %v1626_v32 = vld [vmem:[%s1524_s23 + $0x88] sm:$0xff]  ;;  %v1632_v34 = vld [vmem:[%s1524_s23 + $0x98] sm:$0xff]  ;;  %3452 = vst [vmem:[#allocation27_spill] sm:$0xff] %v1749_v22  ;;  %v1801_v5 = vand.u32 2147483647, %v524_v46 }
  0x4f   : > { %v1629_v33 = vld [vmem:[%s1524_s23 + $0x90] sm:$0xff]  ;;  %3436 = vst [vmem:[#allocation11_spill] sm:$0xff] %v1632_v34  ;;  %v1635_v35 = vld [vmem:[%s1530_s5 + $0x58] sm:$0xff]  ;;  %v1638_v36 = vld [vmem:[%s1530_s5 + $0x60] sm:$0xff] }
  0x50   : > { %v1641_v37 = vld [vmem:[%s1530_s5 + $0x68] sm:$0xff]  ;;  %v1648_v40 = vld [vmem:[%s1524_s23 + $0xa0] sm:$0xff]  ;;  %v1654_v42 = vld [vmem:[%s1524_s23 + $0xb0] sm:$0xff]  ;;  %3457 = vst [vmem:[#allocation32_spill] sm:$0xff] %v1775_v58 }
  0x51   : > { %v1651_v41 = vld [vmem:[%s1524_s23 + $0xa8] sm:$0xff]  ;;  %3438 = vst [vmem:[#allocation13_spill] sm:$0xff] %v1654_v42  ;;  %v1657_v43 = vld [vmem:[%s1530_s5 + $0x70] sm:$0xff]  ;;  %v1660_v44 = vld [vmem:[%s1530_s5 + $0x78] sm:$0xff] }
  0x52   : > { %3437 = vst [vmem:[#allocation12_spill] sm:$0xff] %v1651_v41  ;;  %v1663_v45 = vld [vmem:[%s1530_s5 + $0x80] sm:$0xff]  ;;  %v1674_v50 = vld [vmem:[%s1524_s23 + $0xb8] sm:$0xff]  ;;  %v1680_v52 = vld [vmem:[%s1524_s23 + $0xc8] sm:$0xff] }
  0x53   : > { %v1677_v51 = vld [vmem:[%s1524_s23 + $0xc0] sm:$0xff]  ;;  %3441 = vst [vmem:[#allocation16_spill] sm:$0xff] %v1680_v52  ;;  %v1683_v53 = vld [vmem:[%s1530_s5 + $0x88] sm:$0xff]  ;;  %v1686_v54 = vld [vmem:[%s1530_s5 + $0x90] sm:$0xff] }
  0x54   : > { %3440 = vst [vmem:[#allocation15_spill] sm:$0xff] %v1677_v51  ;;  %v1689_v55 = vld [vmem:[%s1530_s5 + $0x98] sm:$0xff]  ;;  %v1700_v60 = vld [vmem:[%s1524_s23 + $0xd0] sm:$0xff]  ;;  %v1706_v62 = vld [vmem:[%s1524_s23 + $0xe0] sm:$0xff] }
  0x55   : > { %3442 = vst [vmem:[#allocation17_spill] sm:$0xff] %v1689_v55  ;;  %v1703_v61 = vld [vmem:[%s1524_s23 + $0xd8] sm:$0xff]  ;;  %v1709_v63 = vld [vmem:[%s1530_s5 + $0xa0] sm:$0xff]  ;;  %v1712_v0 = vld [vmem:[%s1530_s5 + $0xa8] sm:$0xff] }
  0x56   : > { %3444 = vst [vmem:[#allocation19_spill] sm:$0xff] %v1706_v62  ;;  %v1715_v1 = vld [vmem:[%s1530_s5 + $0xb0] sm:$0xff]  ;;  %v1726_v6 = vld [vmem:[%s1524_s23 + $0xe8] sm:$0xff]  ;;  %v1732_v8 = vld [vmem:[%s1524_s23 + $0xf8] sm:$0xff] }
  0x57   : > { %3445 = vst [vmem:[#allocation20_spill] sm:$0xff] %v1709_v63  ;;  %v1729_v7 = vld [vmem:[%s1524_s23 + $0xf0] sm:$0xff]  ;;  %v1735_v9 = vld [vmem:[%s1530_s5 + $0xb8] sm:$0xff]  ;;  %v1738_v11 = vld [vmem:[%s1530_s5 + $0xc0] sm:$0xff] }
  0x58   : > { %3446 = vst [vmem:[#allocation21_spill] sm:$0xff] %v1712_v0  ;;  %v1741_v15 = vld [vmem:[%s1530_s5 + $0xc8] sm:$0xff]  ;;  %v1752_v24 = vld [vmem:[%s1524_s23 + $0x100] sm:$0xff]  ;;  %v1758_v4 = vld [vmem:[%s1524_s23 + $0x110] sm:$0xff] }
  0x59   : > { %3447 = vst [vmem:[#allocation22_spill] sm:$0xff] %v1715_v1  ;;  %v1755_v31 = vld [vmem:[%s1524_s23 + $0x108] sm:$0xff]  ;;  %v1761_v3 = vld [vmem:[%s1530_s5 + $0xd0] sm:$0xff]  ;;  %v1764_v16 = vld [vmem:[%s1530_s5 + $0xd8] sm:$0xff]  ;;  %v1827_v1 = vand.u32 2147483647, %v525_v47 }
  0x5a   : > { %3449 = vst [vmem:[#allocation24_spill] sm:$0xff] %v1732_v8  ;;  %v1767_v17 = vld [vmem:[%s1530_s5 + $0xe0] sm:$0xff]  ;;  %v1778_v57 = vld [vmem:[%s1524_s23 + $0x118] sm:$0xff]  ;;  %v1784_v48 = vld [vmem:[%s1524_s23 + $0x128] sm:$0xff] }
  0x5b   : > { %3450 = vst [vmem:[#allocation25_spill] sm:$0xff] %v1738_v11  ;;  %v1781_v56 = vld [vmem:[%s1524_s23 + $0x120] sm:$0xff]  ;;  %v1787_v22 = vld [vmem:[%s1530_s5 + $0xe8] sm:$0xff]  ;;  %v1790_v21 = vld [vmem:[%s1530_s5 + $0xf0] sm:$0xff] }
  0x5c   : > { %3451 = vst [vmem:[#allocation26_spill] sm:$0xff] %v1741_v15  ;;  %v1793_v38 = vld [vmem:[%s1530_s5 + $0xf8] sm:$0xff]  ;;  %v1804_v59 = vld [vmem:[%s1524_s23 + $0x130] sm:$0xff]  ;;  %v1810_v55 = vld [vmem:[%s1524_s23 + $0x140] sm:$0xff]  ;;  %v3472_v15 = vsub.f32 %v1570_v10, %v1604_v23 }
  0x5d   : > { %3453 = vst [vmem:[#allocation28_spill] sm:$0xff] %v1758_v4  ;;  %v1807_v49 = vld [vmem:[%s1524_s23 + $0x138] sm:$0xff]  ;;  %v1813_v34 = vld [vmem:[%s1530_s5 + $0x100] sm:$0xff]  ;;  %v1816_v2 = vld [vmem:[%s1530_s5 + $0x108] sm:$0xff] }
  0x5e   : > { %3454 = vst [vmem:[#allocation29_spill] sm:$0xff] %v1761_v3  ;;  %v1819_v39 = vld [vmem:[%s1530_s5 + $0x110] sm:$0xff]  ;;  %v1830_v42 = vld [vmem:[%s1524_s23 + $0x148] sm:$0xff]  ;;  %v1836_v41 = vld [vmem:[%s1524_s23 + $0x158] sm:$0xff]  ;;  %v1856_v52 = vand.u32 2147483647, %v3472_v15  ;;  %v3484_v15 = vsub.f32 %v1577_v13, %v1619_v29 }
  0x5f   : > { %3455 = vst [vmem:[#allocation30_spill] sm:$0xff] %v1764_v16  ;;  %v1833_v0 = vld [vmem:[%s1524_s23 + $0x150] sm:$0xff]  ;;  %v1839_v63 = vld [vmem:[%s1530_s5 + $0x118] sm:$0xff]  ;;  %v1842_v58 = vld [vmem:[%s1530_s5 + $0x120] sm:$0xff] }
  0x60   : > { %3456 = vst [vmem:[#allocation31_spill] sm:$0xff] %v1767_v17  ;;  %v1845_v46 = vld [vmem:[%s1530_s5 + $0x128] sm:$0xff]  ;;  %v1859_v11 = vld [vmem:[%s1524_s23 + $0x160] sm:$0xff]  ;;  %v1868_v3 = vld [vmem:[%s1530_s5 + $0x130] sm:$0xff] }
  0x61   : > { %3458 = vst [vmem:[#allocation33_spill] sm:$0xff] %v1784_v48  ;;  %v1862_v51 = vld [vmem:[%s1524_s23 + $0x168] sm:$0xff]  ;;  %v1871_v47 = vld [vmem:[%s1530_s5 + $0x138] sm:$0xff]  ;;  %v1874_v16 = vld [vmem:[%s1530_s5 + $0x140] sm:$0xff] }
  0x62   : > { %3459 = vst [vmem:[#allocation34_spill] sm:$0xff] %v1787_v22  ;;  %v1888_v17 = vld [vmem:[%s1524_s23 + $0x178] sm:$0xff]  ;;  %v1891_v62 = vld [vmem:[%s1524_s23 + $0x180] sm:$0xff]  ;;  %v1894_v10 = vld [vmem:[%s1524_s23 + $0x188] sm:$0xff] }
  0x63   : > { %3460 = vst [vmem:[#allocation35_spill] sm:$0xff] %v1790_v21  ;;  %v1897_v22 = vld [vmem:[%s1530_s5 + $0x148] sm:$0xff]  ;;  %v1900_v23 = vld [vmem:[%s1530_s5 + $0x150] sm:$0xff]  ;;  %v1903_v21 = vld [vmem:[%s1530_s5 + $0x158] sm:$0xff] }
  0x64   : > { %3461 = vst [vmem:[#allocation36_spill] sm:$0xff] %v1793_v38  ;;  %v1917_v38 = vld [vmem:[%s1524_s23 + $0x190] sm:$0xff]  ;;  %v1920_v8 = vld [vmem:[%s1524_s23 + $0x198] sm:$0xff]  ;;  %v1958_v29 = vld [vmem:[%s1530_s5 + $0x180] sm:$0xff] }
  0x65   : > { %3462 = vst [vmem:[#allocation37_spill] sm:$0xff] %v1801_v5  ;;  %v1865_v5 = vld [vmem:[%s1524_s23 + $0x170] sm:$0xff]  ;;  %v1952_v13 = vld [vmem:[%s1524_s23 + $0x1b8] sm:$0xff]  ;;  %v1978_v48 = vld [vmem:[%s1524_s23 + $0x1c8] sm:$0xff] }
  0x66   : > { %3463 = vst [vmem:[#allocation38_spill] sm:$0xff] %v1810_v55  ;;  %v1949_v4 = vld [vmem:[%s1524_s23 + $0x1b0] sm:$0xff]  ;;  %v2007_v55 = vld [vmem:[%s1524_s23 + $0x1e0] sm:$0xff] }
  0x67   : > { %3464 = vst [vmem:[#allocation39_spill] sm:$0xff] %v1813_v34  ;;  %v1926_v34 = vld [vmem:[%s1530_s5 + $0x160] sm:$0xff] }
  0x68   : > { %3465 = vst [vmem:[#allocation40_spill] sm:$0xff] %v1816_v2  ;;  %v1932_v2 = vld [vmem:[%s1530_s5 + $0x170] sm:$0xff] }
  0x69   : > { %3466 = vst [vmem:[#allocation41_spill] sm:$0xff] %v1819_v39  ;;  %v1946_v39 = vld [vmem:[%s1524_s23 + $0x1a8] sm:$0xff] }
  0x6a   : > { %3467 = vst [vmem:[#allocation42_spill] sm:$0xff] %v1827_v1  ;;  %v3478_v1 = vsub.f32 %v1574_v12, %v1616_v28  ;;  %v1923_v12 = vld [vmem:[%s1524_s23 + $0x1a0] sm:$0xff]  ;;  %v1929_v28 = vld [vmem:[%s1530_s5 + $0x168] sm:$0xff] }
  0x6b   : > { %3468 = vst [vmem:[#allocation43_spill] sm:$0xff] %v1836_v41  ;;  %v2036_v41 = vld [vmem:[%s1524_s23 + $0x1f8] sm:$0xff] }
  0x6c   : > { %3469 = vst [vmem:[#allocation44_spill] sm:$0xff] %v1839_v63  ;;  %v1955_v63 = vld [vmem:[%s1530_s5 + $0x178] sm:$0xff] }
  0x6d   : > { %3470 = vst [vmem:[#allocation45_spill] sm:$0xff] %v1842_v58  ;;  %v1961_v58 = vld [vmem:[%s1530_s5 + $0x188] sm:$0xff] }
  0x6e   : > { %3471 = vst [vmem:[#allocation46_spill] sm:$0xff] %v1845_v46  ;;  %v1975_v46 = vld [vmem:[%s1524_s23 + $0x1c0] sm:$0xff] }
  0x6f   : > { %3473 = vst [vmem:[#allocation47_spill] sm:$0xff] %v1856_v52  ;;  %v1885_v52 = vand.u32 2147483647, %v3478_v1  ;;  %v3490_v1 = vsub.f32 %v1580_v14, %v1622_v30  ;;  %v1981_v14 = vld [vmem:[%s1524_s23 + $0x1d0] sm:$0xff]  ;;  %v1987_v30 = vld [vmem:[%s1530_s5 + $0x198] sm:$0xff] }
  0x70   : > { %3474 = vst [vmem:[#allocation48_spill] sm:$0xff] %v1865_v5  ;;  %v2065_v5 = vld [vmem:[%s1524_s23 + $0x210] sm:$0xff] }
  0x71   : > { %3475 = vst [vmem:[#allocation49_spill] sm:$0xff] %v1868_v3  ;;  %v1984_v3 = vld [vmem:[%s1530_s5 + $0x190] sm:$0xff] }
  0x72   : > { %3476 = vst [vmem:[#allocation50_spill] sm:$0xff] %v1871_v47  ;;  %v1990_v47 = vld [vmem:[%s1530_s5 + $0x1a0] sm:$0xff] }
  0x73   : > { %3477 = vst [vmem:[#allocation51_spill] sm:$0xff] %v1874_v16  ;;  %v2004_v16 = vld [vmem:[%s1524_s23 + $0x1d8] sm:$0xff] }
  0x74   : > { %3479 = vst [vmem:[#allocation52_spill] sm:$0xff] %v1885_v52  ;;  %v1914_v52 = vand.u32 2147483647, %v3484_v15  ;;  %v3497_v15 = vsub.f32 %v1589_v18, %v1635_v35  ;;  %v2010_v18 = vld [vmem:[%s1524_s23 + $0x1e8] sm:$0xff]  ;;  %v2016_v35 = vld [vmem:[%s1530_s5 + $0x1b0] sm:$0xff] }
  0x75   : > { %3480 = vst [vmem:[#allocation53_spill] sm:$0xff] %v1894_v10  ;;  %v2094_v10 = vld [vmem:[%s1524_s23 + $0x228] sm:$0xff] }
  0x76   : > { %3481 = vst [vmem:[#allocation54_spill] sm:$0xff] %v1897_v22  ;;  %v2013_v22 = vld [vmem:[%s1530_s5 + $0x1a8] sm:$0xff] }
  0x77   : > { %3482 = vst [vmem:[#allocation55_spill] sm:$0xff] %v1900_v23  ;;  %v2019_v23 = vld [vmem:[%s1530_s5 + $0x1b8] sm:$0xff] }
  0x78   : > { %3483 = vst [vmem:[#allocation56_spill] sm:$0xff] %v1903_v21  ;;  %v2033_v21 = vld [vmem:[%s1524_s23 + $0x1f0] sm:$0xff] }
  0x79   : > { %3485 = vst [vmem:[#allocation57_spill] sm:$0xff] %v1914_v52  ;;  %v1943_v52 = vand.u32 2147483647, %v3490_v1  ;;  %v3504_v1 = vsub.f32 %v1592_v19, %v1638_v36  ;;  %v2039_v19 = vld [vmem:[%s1524_s23 + $0x200] sm:$0xff]  ;;  %v2045_v36 = vld [vmem:[%s1530_s5 + $0x1c8] sm:$0xff] }
  0x7a   : > { %3486 = vst [vmem:[#allocation58_spill] sm:$0xff] %v1923_v12  ;;  %v2123_v12 = vld [vmem:[%s1524_s23 + $0x240] sm:$0xff] }
  0x7b   : > { %3487 = vst [vmem:[#allocation59_spill] sm:$0xff] %v1926_v34  ;;  %v2042_v34 = vld [vmem:[%s1530_s5 + $0x1c0] sm:$0xff] }
  0x7c   : > { %3488 = vst [vmem:[#allocation60_spill] sm:$0xff] %v1929_v28  ;;  %v2048_v28 = vld [vmem:[%s1530_s5 + $0x1d0] sm:$0xff] }
  0x7d   : > { %3489 = vst [vmem:[#allocation61_spill] sm:$0xff] %v1932_v2  ;;  %v2062_v2 = vld [vmem:[%s1524_s23 + $0x208] sm:$0xff] }
  0x7e   : > { %3491 = vst [vmem:[#allocation62_spill] sm:$0xff] %v1943_v52  ;;  %v1972_v52 = vand.u32 2147483647, %v3497_v15  ;;  %v3512_v15 = vsub.f32 %v1595_v20, %v1641_v37  ;;  %v2068_v20 = vld [vmem:[%s1524_s23 + $0x218] sm:$0xff]  ;;  %v2074_v37 = vld [vmem:[%s1530_s5 + $0x1e0] sm:$0xff] }
  0x7f   : > { %3492 = vst [vmem:[#allocation63_spill] sm:$0xff] %v1949_v4  ;;  %v2152_v4 = vld [vmem:[%s1524_s23 + $0x258] sm:$0xff] }
  0x80   : > { %3493 = vst [vmem:[#allocation64_spill] sm:$0xff] %v1952_v13  ;;  %v2149_v13 = vld [vmem:[%s1524_s23 + $0x250] sm:$0xff] }
  0x81   : > { %3494 = vst [vmem:[#allocation65_spill] sm:$0xff] %v1955_v63  ;;  %v2071_v63 = vld [vmem:[%s1530_s5 + $0x1d8] sm:$0xff] }
  0x82   : > { %3495 = vst [vmem:[#allocation66_spill] sm:$0xff] %v1958_v29  ;;  %v2077_v29 = vld [vmem:[%s1530_s5 + $0x1e8] sm:$0xff] }
  0x83   : > { %3496 = vst [vmem:[#allocation67_spill] sm:$0xff] %v1961_v58  ;;  %v2091_v58 = vld [vmem:[%s1524_s23 + $0x220] sm:$0xff] }
  0x84   : > { %3498 = vst [vmem:[#allocation68_spill] sm:$0xff] %v1972_v52  ;;  %v2001_v52 = vand.u32 2147483647, %v3504_v1  ;;  %v3519_v1 = vsub.f32 %v1607_v25, %v1657_v43  ;;  %v2097_v25 = vld [vmem:[%s1524_s23 + $0x230] sm:$0xff]  ;;  %v2103_v43 = vld [vmem:[%s1530_s5 + $0x1f8] sm:$0xff] }
  0x85   : > { %3499 = vst [vmem:[#allocation69_spill] sm:$0xff] %v1978_v48  ;;  %v2181_v48 = vld [vmem:[%s1524_s23 + $0x270] sm:$0xff] }
  0x86   : > { %3500 = vst [vmem:[#allocation70_spill] sm:$0xff] %v1981_v14  ;;  %v2178_v14 = vld [vmem:[%s1524_s23 + $0x268] sm:$0xff] }
  0x87   : > { %3501 = vst [vmem:[#allocation71_spill] sm:$0xff] %v1984_v3  ;;  %v2100_v3 = vld [vmem:[%s1530_s5 + $0x1f0] sm:$0xff] }
  0x88   : > { %3502 = vst [vmem:[#allocation72_spill] sm:$0xff] %v1987_v30  ;;  %v2106_v30 = vld [vmem:[%s1530_s5 + $0x200] sm:$0xff] }
  0x89   : > { %3503 = vst [vmem:[#allocation73_spill] sm:$0xff] %v1990_v47  ;;  %v2120_v47 = vld [vmem:[%s1524_s23 + $0x238] sm:$0xff] }
  0x8a   : > { %3505 = vst [vmem:[#allocation74_spill] sm:$0xff] %v2001_v52  ;;  %v2030_v52 = vand.u32 2147483647, %v3512_v15  ;;  %v3527_v15 = vsub.f32 %v1610_v26, %v1660_v44  ;;  %v2126_v26 = vld [vmem:[%s1524_s23 + $0x248] sm:$0xff]  ;;  %v2132_v44 = vld [vmem:[%s1530_s5 + $0x210] sm:$0xff] }
  0x8b   : > { %3506 = vst [vmem:[#allocation75_spill] sm:$0xff] %v2004_v16  ;;  %v2210_v16 = vld [vmem:[%s1524_s23 + $0x288] sm:$0xff] }
  0x8c   : > { %3507 = vst [vmem:[#allocation76_spill] sm:$0xff] %v2007_v55  ;;  %v2207_v55 = vld [vmem:[%s1524_s23 + $0x280] sm:$0xff] }
  0x8d   : > { %3508 = vst [vmem:[#allocation77_spill] sm:$0xff] %v2010_v18 }
  0x8e   : > { %3509 = vst [vmem:[#allocation78_spill] sm:$0xff] %v2013_v22  ;;  %v2129_v22 = vld [vmem:[%s1530_s5 + $0x208] sm:$0xff] }
  0x8f   : > { %3510 = vst [vmem:[#allocation79_spill] sm:$0xff] %v2016_v35  ;;  %v2135_v35 = vld [vmem:[%s1530_s5 + $0x218] sm:$0xff] }
  0x90   : > { %3511 = vst [vmem:[#allocation80_spill] sm:$0xff] %v2019_v23 }
  0x91   : > { %3513 = vst [vmem:[#allocation81_spill] sm:$0xff] %v2030_v52  ;;  %v2059_v52 = vand.u32 2147483647, %v3519_v1  ;;  %v3535_v1 = vsub.f32 %v1613_v27, %v1663_v45  ;;  %v2155_v27 = vld [vmem:[%s1524_s23 + $0x260] sm:$0xff]  ;;  %v2161_v45 = vld [vmem:[%s1530_s5 + $0x228] sm:$0xff] }
  0x92   : > { %3514 = vst [vmem:[#allocation82_spill] sm:$0xff] %v2033_v21  ;;  %v2236_v21 = vld [vmem:[%s1524_s23 + $0x298] sm:$0xff] }
  0x93   : > { %3515 = vst [vmem:[#allocation83_spill] sm:$0xff] %v2036_v41 }
  0x94   : > { %3516 = vst [vmem:[#allocation84_spill] sm:$0xff] %v2042_v34  ;;  %v2158_v34 = vld [vmem:[%s1530_s5 + $0x220] sm:$0xff] }
  0x95   : > { %3517 = vst [vmem:[#allocation85_spill] sm:$0xff] %v2045_v36  ;;  %v2164_v36 = vld [vmem:[%s1530_s5 + $0x230] sm:$0xff] }
  0x96   : > { %3518 = vst [vmem:[#allocation86_spill] sm:$0xff] %v2048_v28 }
  0x97   : > { %3520 = vst [vmem:[#allocation87_spill] sm:$0xff] %v2059_v52  ;;  %v2088_v52 = vand.u32 2147483647, %v3527_v15  ;;  %v3541_v15 = vsub.f32 %v1626_v32, %v1683_v53  ;;  %v2184_v32 = vld [vmem:[%s1524_s23 + $0x278] sm:$0xff]  ;;  %v2190_v53 = vld [vmem:[%s1530_s5 + $0x240] sm:$0xff] }
  0x98   : > { %3521 = vst [vmem:[#allocation88_spill] sm:$0xff] %v2062_v2  ;;  %v2268_v2 = vld [vmem:[%s1524_s23 + $0x2b8] sm:$0xff] }
  0x99   : > { %3522 = vst [vmem:[#allocation89_spill] sm:$0xff] %v2065_v5  ;;  %v2146_v23 = vand.u32 2147483647, %v3541_v15  ;;  %v3556_v15 = vld [vmem:[#allocation11_spill] sm:$0xff]  ;;  %v2265_v5 = vld [vmem:[%s1524_s23 + $0x2b0] sm:$0xff] }
  0x9a   : > { %3523 = vst [vmem:[#allocation90_spill] sm:$0xff] %v2068_v20 }
  0x9b   : > { %3524 = vst [vmem:[#allocation91_spill] sm:$0xff] %v2071_v63  ;;  %v2187_v63 = vld [vmem:[%s1530_s5 + $0x238] sm:$0xff] }
  0x9c   : > { %3525 = vst [vmem:[#allocation92_spill] sm:$0xff] %v2074_v37  ;;  %v2193_v37 = vld [vmem:[%s1530_s5 + $0x248] sm:$0xff] }
  0x9d   : > { %3526 = vst [vmem:[#allocation93_spill] sm:$0xff] %v2077_v29 }
  0x9e   : > { %3528 = vst [vmem:[#allocation94_spill] sm:$0xff] %v2088_v52  ;;  %v2117_v52 = vand.u32 2147483647, %v3535_v1  ;;  %v3548_v1 = vsub.f32 %v1629_v33, %v1686_v54  ;;  %v2213_v33 = vld [vmem:[%s1524_s23 + $0x290] sm:$0xff]  ;;  %v2219_v54 = vld [vmem:[%s1530_s5 + $0x258] sm:$0xff] }
  0x9f   : > { %3529 = vst [vmem:[#allocation95_spill] sm:$0xff] %v2091_v58  ;;  %v2297_v58 = vld [vmem:[%s1524_s23 + $0x2d0] sm:$0xff] }
  0xa0   : > { %3530 = vst [vmem:[#allocation96_spill] sm:$0xff] %v2094_v10  ;;  %v2175_v28 = vand.u32 2147483647, %v3548_v1  ;;  %v3566_v1 = vld [vmem:[#allocation20_spill] sm:$0xff] }
  0xa1   : > { %3531 = vst [vmem:[#allocation97_spill] sm:$0xff] %v2097_v25  ;;  %v2294_v10 = vld [vmem:[%s1524_s23 + $0x2c8] sm:$0xff] }
  0xa2   : > { %3532 = vst [vmem:[#allocation98_spill] sm:$0xff] %v2100_v3  ;;  %v2216_v3 = vld [vmem:[%s1530_s5 + $0x250] sm:$0xff] }
  0xa3   : > { %3533 = vst [vmem:[#allocation99_spill] sm:$0xff] %v2103_v43  ;;  %v2222_v43 = vld [vmem:[%s1530_s5 + $0x260] sm:$0xff] }
  0xa4   : > { %3534 = vst [vmem:[#allocation100_spill] sm:$0xff] %v2106_v30  ;;  %v2239_v30 = vld [vmem:[%s1524_s23 + $0x2a0] sm:$0xff] }
  0xa5   : > { %3536 = vst [vmem:[#allocation101_spill] sm:$0xff] %v2120_v47  ;;  %v2309_v47 = vld [vmem:[%s1530_s5 + $0x2a8] sm:$0xff] }
  0xa6   : > { %3537 = vst [vmem:[#allocation102_spill] sm:$0xff] %v2126_v26  ;;  %v2326_v26 = vld [vmem:[%s1524_s23 + $0x2e8] sm:$0xff] }
  0xa7   : > { %3538 = vst [vmem:[#allocation103_spill] sm:$0xff] %v2129_v22  ;;  %v2245_v22 = vld [vmem:[%s1530_s5 + $0x268] sm:$0xff] }
  0xa8   : > { %3539 = vst [vmem:[#allocation104_spill] sm:$0xff] %v2132_v44  ;;  %v2251_v44 = vld [vmem:[%s1530_s5 + $0x278] sm:$0xff] }
  0xa9   : > { %3540 = vst [vmem:[#allocation105_spill] sm:$0xff] %v2135_v35 }
  0xaa   : > { %3542 = vst [vmem:[#allocation106_spill] sm:$0xff] %v2149_v13  ;;  %v2355_v13 = vld [vmem:[%s1524_s23 + $0x300] sm:$0xff] }
  0xab   : > { %3543 = vst [vmem:[#allocation107_spill] sm:$0xff] %v2152_v4  ;;  %v2352_v4 = vld [vmem:[%s1524_s23 + $0x2f8] sm:$0xff] }
  0xac   : > { %3544 = vst [vmem:[#allocation108_spill] sm:$0xff] %v2155_v27 }
  0xad   : > { %3545 = vst [vmem:[#allocation109_spill] sm:$0xff] %v2158_v34  ;;  %v2274_v34 = vld [vmem:[%s1530_s5 + $0x280] sm:$0xff] }
  0xae   : > { %3546 = vst [vmem:[#allocation110_spill] sm:$0xff] %v2161_v45  ;;  %v2280_v45 = vld [vmem:[%s1530_s5 + $0x290] sm:$0xff] }
  0xaf   : > { %3547 = vst [vmem:[#allocation111_spill] sm:$0xff] %v2164_v36 }
  0xb0   : > { %3549 = vst [vmem:[#allocation112_spill] sm:$0xff] %v2175_v28  ;;  %v3557_v28 = vld [vmem:[#allocation17_spill] sm:$0xff] }
  0xb1   : > { %3550 = vst [vmem:[#allocation113_spill] sm:$0xff] %v2178_v14  ;;  %v3558_v29 = vsub.f32 %v3556_v15, %v3557_v28  ;;  %v2242_v28 = vld [vmem:[%s1524_s23 + $0x2a8] sm:$0xff]  ;;  %v2381_v14 = vld [vmem:[%s1524_s23 + $0x310] sm:$0xff] }
  0xb2   : > { %3551 = vst [vmem:[#allocation114_spill] sm:$0xff] %v2181_v48  ;;  %v3575_v15 = vld [vmem:[#allocation12_spill] sm:$0xff] }
  0xb3   : > { %3552 = vst [vmem:[#allocation115_spill] sm:$0xff] %v2184_v32  ;;  %v2204_v18 = vand.u32 2147483647, %v3558_v29  ;;  %v2248_v29 = vld [vmem:[%s1530_s5 + $0x270] sm:$0xff] }
  0xb4   : > { %3553 = vst [vmem:[#allocation116_spill] sm:$0xff] %v2187_v63  ;;  %v2303_v63 = vld [vmem:[%s1530_s5 + $0x298] sm:$0xff] }
  0xb5   : > { %3554 = vst [vmem:[#allocation117_spill] sm:$0xff] %v2190_v53  ;;  %v2384_v53 = vld [vmem:[%s1524_s23 + $0x318] sm:$0xff] }
  0xb6   : > { %3555 = vst [vmem:[#allocation118_spill] sm:$0xff] %v2193_v37  ;;  %v2323_v37 = vld [vmem:[%s1524_s23 + $0x2e0] sm:$0xff] }
  0xb7   : > { %3559 = vst [vmem:[#allocation11_spill] sm:$0xff] %v2204_v18  ;;  %v3567_v18 = vsub.f32 %v1648_v40, %v3566_v1  ;;  %v2271_v40 = vld [vmem:[%s1524_s23 + $0x2c0] sm:$0xff]  ;;  %v3585_v1 = vld [vmem:[#allocation13_spill] sm:$0xff] }
  0xb8   : > { %3560 = vst [vmem:[#allocation17_spill] sm:$0xff] %v2207_v55  ;;  %v2413_v55 = vld [vmem:[%s1524_s23 + $0x330] sm:$0xff] }
  0xb9   : > { %3561 = vst [vmem:[#allocation119_spill] sm:$0xff] %v2210_v16  ;;  %v2233_v41 = vand.u32 2147483647, %v3567_v18  ;;  %v2277_v18 = vld [vmem:[%s1530_s5 + $0x288] sm:$0xff] }
  0xba   : > { %3562 = vst [vmem:[#allocation120_spill] sm:$0xff] %v2213_v33  ;;  %v2410_v16 = vld [vmem:[%s1524_s23 + $0x328] sm:$0xff] }
  0xbb   : > { %3563 = vst [vmem:[#allocation121_spill] sm:$0xff] %v2216_v3  ;;  %v2332_v3 = vld [vmem:[%s1530_s5 + $0x2b0] sm:$0xff] }
  0xbc   : > { %3564 = vst [vmem:[#allocation122_spill] sm:$0xff] %v2219_v54  ;;  %v2338_v54 = vld [vmem:[%s1530_s5 + $0x2c0] sm:$0xff] }
  0xbd   : > { %3565 = vst [vmem:[#allocation123_spill] sm:$0xff] %v2222_v43 }
  0xbe   : > { %3568 = vst [vmem:[#allocation20_spill] sm:$0xff] %v2233_v41  ;;  %v3576_v41 = vld [vmem:[#allocation21_spill] sm:$0xff] }
  0xbf   : > { %3569 = vst [vmem:[#allocation124_spill] sm:$0xff] %v2236_v21  ;;  %v3577_v35 = vsub.f32 %v3575_v15, %v3576_v41  ;;  %v2300_v41 = vld [vmem:[%s1524_s23 + $0x2d8] sm:$0xff]  ;;  %v3594_v15 = vsub.f32 %v1674_v50, %v1735_v9  ;;  %v2358_v50 = vld [vmem:[%s1524_s23 + $0x308] sm:$0xff]  ;;  %v2364_v9 = vld [vmem:[%s1530_s5 + $0x2d0] sm:$0xff] }
  0xc0   : > { %3570 = vst [vmem:[#allocation125_spill] sm:$0xff] %v2239_v30  ;;  %v2442_v30 = vld [vmem:[%s1524_s23 + $0x348] sm:$0xff] }
  0xc1   : > { %3571 = vst [vmem:[#allocation126_spill] sm:$0xff] %v2242_v28  ;;  %v2262_v20 = vand.u32 2147483647, %v3577_v35  ;;  %v2306_v35 = vld [vmem:[%s1530_s5 + $0x2a0] sm:$0xff]  ;;  %v2477_v21 = vld [vmem:[%s1530_s5 + $0x328] sm:$0xff] }
  0xc2   : > { %3572 = vst [vmem:[#allocation127_spill] sm:$0xff] %v2245_v22  ;;  %v2361_v22 = vld [vmem:[%s1530_s5 + $0x2c8] sm:$0xff]  ;;  %v2439_v28 = vld [vmem:[%s1524_s23 + $0x340] sm:$0xff] }
  0xc3   : > { %3573 = vst [vmem:[#allocation128_spill] sm:$0xff] %v2248_v29  ;;  %v2367_v29 = vld [vmem:[%s1530_s5 + $0x2d8] sm:$0xff] }
  0xc4   : > { %3574 = vst [vmem:[#allocation129_spill] sm:$0xff] %v2251_v44  ;;  %v3611_v44 = vld [vmem:[#allocation26_spill] sm:$0xff] }
  0xc5   : > { %3578 = vst [vmem:[#allocation12_spill] sm:$0xff] %v2262_v20  ;;  %v3586_v20 = vld [vmem:[#allocation22_spill] sm:$0xff] }
  0xc6   : > { %3579 = vst [vmem:[#allocation21_spill] sm:$0xff] %v2265_v5  ;;  %v3587_v36 = vsub.f32 %v3585_v1, %v3586_v20  ;;  %v2329_v20 = vld [vmem:[%s1524_s23 + $0x2f0] sm:$0xff]  ;;  %v3602_v1 = vld [vmem:[#allocation15_spill] sm:$0xff] }
  0xc7   : > { %3580 = vst [vmem:[#allocation130_spill] sm:$0xff] %v2268_v2  ;;  %v2471_v5 = vld [vmem:[%s1524_s23 + $0x360] sm:$0xff] }
  0xc8   : > { %3581 = vst [vmem:[#allocation131_spill] sm:$0xff] %v2271_v40  ;;  %v2291_v25 = vand.u32 2147483647, %v3587_v36  ;;  %v2335_v36 = vld [vmem:[%s1530_s5 + $0x2b8] sm:$0xff] }
  0xc9   : > { %3582 = vst [vmem:[#allocation132_spill] sm:$0xff] %v2274_v34  ;;  %v2390_v34 = vld [vmem:[%s1530_s5 + $0x2e0] sm:$0xff]  ;;  %v2468_v40 = vld [vmem:[%s1524_s23 + $0x358] sm:$0xff] }
  0xca   : > { %3583 = vst [vmem:[#allocation133_spill] sm:$0xff] %v2277_v18  ;;  %v2396_v18 = vld [vmem:[%s1530_s5 + $0x2f0] sm:$0xff] }
  0xcb   : > { %3584 = vst [vmem:[#allocation134_spill] sm:$0xff] %v2280_v45 }
  0xcc   : > { %3588 = vst [vmem:[#allocation13_spill] sm:$0xff] %v2291_v25  ;;  %v2320_v25 = vand.u32 2147483647, %v3594_v15  ;;  %v3610_v15 = vld [vmem:[#allocation16_spill] sm:$0xff] }
  0xcd   : > { %3589 = vst [vmem:[#allocation22_spill] sm:$0xff] %v2297_v58  ;;  %v3612_v32 = vsub.f32 %v3610_v15, %v3611_v44  ;;  %v2416_v44 = vld [vmem:[%s1524_s23 + $0x338] sm:$0xff] }
  0xce   : > { %3590 = vst [vmem:[#allocation135_spill] sm:$0xff] %v2300_v41  ;;  %v3627_v15 = vld [vmem:[#allocation30_spill] sm:$0xff]  ;;  %v2497_v41 = vld [vmem:[%s1524_s23 + $0x370] sm:$0xff] }
  0xcf   : > { %3591 = vst [vmem:[#allocation136_spill] sm:$0xff] %v2303_v63  ;;  %v2378_v48 = vand.u32 2147483647, %v3612_v32  ;;  %v2419_v63 = vld [vmem:[%s1530_s5 + $0x2f8] sm:$0xff]  ;;  %v2422_v32 = vld [vmem:[%s1530_s5 + $0x300] sm:$0xff] }
  0xd0   : > { %3592 = vst [vmem:[#allocation137_spill] sm:$0xff] %v2306_v35  ;;  %v2425_v35 = vld [vmem:[%s1530_s5 + $0x308] sm:$0xff]  ;;  %v2500_v58 = vld [vmem:[%s1524_s23 + $0x378] sm:$0xff] }
  0xd1   : > { %3593 = vst [vmem:[#allocation138_spill] sm:$0xff] %v2309_v47 }
  0xd2   : > { %3595 = vst [vmem:[#allocation139_spill] sm:$0xff] %v2320_v25  ;;  %v3603_v25 = vld [vmem:[#allocation25_spill] sm:$0xff] }
  0xd3   : > { %3596 = vst [vmem:[#allocation140_spill] sm:$0xff] %v2323_v37  ;;  %v3604_v43 = vsub.f32 %v3602_v1, %v3603_v25  ;;  %v2387_v25 = vld [vmem:[%s1524_s23 + $0x320] sm:$0xff]  ;;  %v3618_v1 = vld [vmem:[#allocation29_spill] sm:$0xff]  ;;  %v2532_v37 = vld [vmem:[%s1524_s23 + $0x398] sm:$0xff] }
  0xd4   : > { %3597 = vst [vmem:[#allocation141_spill] sm:$0xff] %v2326_v26  ;;  %v3619_v45 = vsub.f32 %v1700_v60, %v3618_v1  ;;  %v2445_v60 = vld [vmem:[%s1524_s23 + $0x350] sm:$0xff]  ;;  %v3634_v1 = vld [vmem:[#allocation19_spill] sm:$0xff] }
  0xd5   : > { %3598 = vst [vmem:[#allocation142_spill] sm:$0xff] %v2329_v20  ;;  %v2349_v27 = vand.u32 2147483647, %v3604_v43  ;;  %v2393_v43 = vld [vmem:[%s1530_s5 + $0x2e8] sm:$0xff]  ;;  %v2529_v26 = vld [vmem:[%s1524_s23 + $0x390] sm:$0xff] }
  0xd6   : > { %3599 = vst [vmem:[#allocation143_spill] sm:$0xff] %v2332_v3  ;;  %v2407_v33 = vand.u32 2147483647, %v3619_v45  ;;  %v2448_v3 = vld [vmem:[%s1530_s5 + $0x310] sm:$0xff]  ;;  %v2451_v45 = vld [vmem:[%s1530_s5 + $0x318] sm:$0xff]  ;;  %v2526_v20 = vld [vmem:[%s1524_s23 + $0x388] sm:$0xff] }
  0xd7   : > { %3600 = vst [vmem:[#allocation144_spill] sm:$0xff] %v2335_v36  ;;  %v2454_v36 = vld [vmem:[%s1530_s5 + $0x320] sm:$0xff] }
  0xd8   : > { %3601 = vst [vmem:[#allocation145_spill] sm:$0xff] %v2338_v54 }
  0xd9   : > { %3605 = vst [vmem:[#allocation15_spill] sm:$0xff] %v2352_v4  ;;  %v2555_v4 = vld [vmem:[%s1524_s23 + $0x3a0] sm:$0xff] }
  0xda   : > { %3606 = vst [vmem:[#allocation25_spill] sm:$0xff] %v2355_v13 }
  0xdb   : > { %3607 = vst [vmem:[#allocation146_spill] sm:$0xff] %v2358_v50  ;;  %v2561_v50 = vld [vmem:[%s1530_s5 + $0x370] sm:$0xff] }
  0xdc   : > { %3608 = vst [vmem:[#allocation147_spill] sm:$0xff] %v2364_v9  ;;  %v2483_v9 = vld [vmem:[%s1530_s5 + $0x338] sm:$0xff] }
  0xdd   : > { %3609 = vst [vmem:[#allocation148_spill] sm:$0xff] %v2367_v29 }
  0xde   : > { %3613 = vst [vmem:[#allocation16_spill] sm:$0xff] %v2384_v53  ;;  %v2585_v53 = vld [vmem:[%s1524_s23 + $0x3c0] sm:$0xff] }
  0xdf   : > { %3614 = vst [vmem:[#allocation26_spill] sm:$0xff] %v2387_v25  ;;  %v2579_v25 = vld [vmem:[%s1524_s23 + $0x3b0] sm:$0xff] }
  0xe0   : > { %3615 = vst [vmem:[#allocation149_spill] sm:$0xff] %v2390_v34  ;;  %v2506_v34 = vld [vmem:[%s1530_s5 + $0x340] sm:$0xff] }
  0xe1   : > { %3616 = vst [vmem:[#allocation150_spill] sm:$0xff] %v2393_v43  ;;  %v2512_v43 = vld [vmem:[%s1530_s5 + $0x350] sm:$0xff] }
  0xe2   : > { %3617 = vst [vmem:[#allocation151_spill] sm:$0xff] %v2396_v18 }
  0xe3   : > { %3620 = vst [vmem:[#allocation29_spill] sm:$0xff] %v2407_v33  ;;  %v3628_v33 = vsub.f32 %v1703_v61, %v3627_v15  ;;  %v2474_v61 = vld [vmem:[%s1524_s23 + $0x368] sm:$0xff]  ;;  %v3642_v15 = vld [vmem:[#allocation34_spill] sm:$0xff] }
  0xe4   : > { %3621 = vst [vmem:[#allocation152_spill] sm:$0xff] %v2410_v16  ;;  %v2612_v16 = vld [vmem:[%s1530_s5 + $0x3a8] sm:$0xff] }
  0xe5   : > { %3622 = vst [vmem:[#allocation153_spill] sm:$0xff] %v2413_v55  ;;  %v2436_v47 = vand.u32 2147483647, %v3628_v33  ;;  %v2480_v33 = vld [vmem:[%s1530_s5 + $0x330] sm:$0xff]  ;;  %v2609_v55 = vld [vmem:[%s1530_s5 + $0x3a0] sm:$0xff] }
  0xe6   : > { %3623 = vst [vmem:[#allocation154_spill] sm:$0xff] %v2416_v44 }
  0xe7   : > { %3624 = vst [vmem:[#allocation155_spill] sm:$0xff] %v2419_v63 }
  0xe8   : > { %3625 = vst [vmem:[#allocation156_spill] sm:$0xff] %v2422_v32  ;;  %v2541_v32 = vld [vmem:[%s1530_s5 + $0x368] sm:$0xff] }
  0xe9   : > { %3626 = vst [vmem:[#allocation157_spill] sm:$0xff] %v2425_v35  ;;  %v2558_v35 = vld [vmem:[%s1524_s23 + $0x3a8] sm:$0xff] }
  0xea   : > { %3629 = vst [vmem:[#allocation30_spill] sm:$0xff] %v2436_v47  ;;  %v3635_v47 = vld [vmem:[#allocation31_spill] sm:$0xff] }
  0xeb   : > { %3630 = vst [vmem:[#allocation158_spill] sm:$0xff] %v2442_v30  ;;  %v3636_v2 = vsub.f32 %v3634_v1, %v3635_v47  ;;  %v2503_v47 = vld [vmem:[%s1524_s23 + $0x380] sm:$0xff] }
  0xec   : > { %3631 = vst [vmem:[#allocation159_spill] sm:$0xff] %v2445_v60  ;;  %v3648_v1 = vld [vmem:[#allocation35_spill] sm:$0xff]  ;;  %v2626_v60 = vld [vmem:[%s1530_s5 + $0x3b0] sm:$0xff] }
  0xed   : > { %3632 = vst [vmem:[#allocation160_spill] sm:$0xff] %v2451_v45  ;;  %v2465_v54 = vand.u32 2147483647, %v3636_v2  ;;  %v2509_v2 = vld [vmem:[%s1530_s5 + $0x348] sm:$0xff]  ;;  %v2582_v45 = vld [vmem:[%s1524_s23 + $0x3b8] sm:$0xff]  ;;  %v2632_v30 = vld [vmem:[%s1530_s5 + $0x3c0] sm:$0xff] }
  0xee   : > { %3633 = vst [vmem:[#allocation161_spill] sm:$0xff] %v2454_v36 }
  0xef   : > { %3637 = vst [vmem:[#allocation19_spill] sm:$0xff] %v2465_v54  ;;  %v3643_v54 = vsub.f32 %v1726_v6, %v3642_v15  ;;  %v2535_v6 = vld [vmem:[%s1530_s5 + $0x358] sm:$0xff]  ;;  %v3653_v15 = vld [vmem:[#allocation24_spill] sm:$0xff] }
  0xf0   : > { %3638 = vst [vmem:[#allocation31_spill] sm:$0xff] %v2474_v61  ;;  %v2652_v61 = vld [vmem:[%s1530_s5 + $0x3d0] sm:$0xff] }
  0xf1   : > { %3639 = vst [vmem:[#allocation162_spill] sm:$0xff] %v2477_v21  ;;  %v2494_v29 = vand.u32 2147483647, %v3643_v54  ;;  %v2538_v54 = vld [vmem:[%s1530_s5 + $0x360] sm:$0xff]  ;;  %v2591_v21 = vld [vmem:[%s1530_s5 + $0x390] sm:$0xff] }
  0xf2   : > { %3640 = vst [vmem:[#allocation163_spill] sm:$0xff] %v2480_v33  ;;  %v2606_v33 = vld [vmem:[%s1524_s23 + $0x3c8] sm:$0xff] }
  0xf3   : > { %3641 = vst [vmem:[#allocation164_spill] sm:$0xff] %v2483_v9 }
  0xf4   : > { %3644 = vst [vmem:[#allocation34_spill] sm:$0xff] %v2494_v29  ;;  %v3649_v29 = vsub.f32 %v1729_v7, %v3648_v1  ;;  %v2564_v7 = vld [vmem:[%s1530_s5 + $0x378] sm:$0xff]  ;;  %v2588_v1 = vld [vmem:[%s1530_s5 + $0x388] sm:$0xff] }
  0xf5   : > { %3645 = vst [vmem:[#allocation165_spill] sm:$0xff] %v2503_v47  ;;  %v3680_v47 = vld [vmem:[#allocation33_spill] sm:$0xff] }
  0xf6   : > { %3646 = vst [vmem:[#allocation166_spill] sm:$0xff] %v2509_v2  ;;  %v2523_v18 = vand.u32 2147483647, %v3649_v29  ;;  %v2567_v29 = vld [vmem:[%s1530_s5 + $0x380] sm:$0xff]  ;;  %v2629_v2 = vld [vmem:[%s1530_s5 + $0x3b8] sm:$0xff] }
  0xf7   : > { %3647 = vst [vmem:[#allocation167_spill] sm:$0xff] %v2512_v43 }
  0xf8   : > { %3650 = vst [vmem:[#allocation35_spill] sm:$0xff] %v2523_v18  ;;  %v3654_v18 = vld [vmem:[#allocation36_spill] sm:$0xff] }
  0xf9   : > { %3651 = vst [vmem:[#allocation168_spill] sm:$0xff] %v2529_v26  ;;  %v3655_v13 = vsub.f32 %v3653_v15, %v3654_v18  ;;  %v3659_v15 = vld [vmem:[#allocation39_spill] sm:$0xff] }
  0xfa   : > { %3652 = vst [vmem:[#allocation169_spill] sm:$0xff] %v2541_v32  ;;  %v3673_v32 = vld [vmem:[#allocation44_spill] sm:$0xff] }
  0xfb   : > { %v2552_v63 = vand.u32 2147483647, %v3655_v13  ;;  %3657 = vst [vmem:[#allocation36_spill] sm:$0xff] %v2564_v7  ;;  %v2594_v13 = vld [vmem:[%s1530_s5 + $0x398] sm:$0xff] }
  0xfc   : > { %3658 = vst [vmem:[#allocation170_spill] sm:$0xff] %v2567_v29  ;;  %v3678_v29 = vld [vmem:[#allocation45_spill] sm:$0xff]  ;;  %v3681_v7 = vld [vmem:[#allocation46_spill] sm:$0xff] }
  0xfd   : > { %3656 = vst [vmem:[#allocation24_spill] sm:$0xff] %v2552_v63  ;;  %v3660_v63 = vsub.f32 %v1752_v24, %v3659_v15  ;;  %v3665_v15 = vld [vmem:[#allocation40_spill] sm:$0xff]  ;;  %v3682_v18 = vsub.f32 %v3680_v47, %v3681_v7  ;;  %v3694_v47 = vld [vmem:[#allocation54_spill] sm:$0xff] }
  0xfe   : > { %3661 = vst [vmem:[#allocation39_spill] sm:$0xff] %v2579_v25  ;;  %v3666_v9 = vsub.f32 %v1755_v31, %v3665_v15  ;;  %v3667_v31 = vld [vmem:[#allocation28_spill] sm:$0xff]  ;;  %v3668_v15 = vld [vmem:[#allocation41_spill] sm:$0xff]  ;;  %v3695_v25 = vsub.f32 %v1830_v42, %v3694_v47 }
  0xff   : > { %v679_v36 = vand.u32 2147483647, %v3660_v63  ;;  %3662 = vst [vmem:[#allocation171_spill] sm:$0xff] %v2582_v45  ;;  %v3683_v63 = vld [vmem:[#allocation14_spill] sm:$0xff]  ;;  %v3706_v47 = vld [vmem:[#allocation61_spill] sm:$0xff] }
 0x100   : > { %3663 = vst [vmem:[#allocation172_spill] sm:$0xff] %v2588_v1  ;;  %v680_v44 = vand.u32 2147483647, %v3666_v9  ;;  %v3669_v9 = vsub.f32 %v3667_v31, %v3668_v15  ;;  %v3674_v31 = vsub.f32 %v1778_v57, %v3673_v32  ;;  %v3679_v57 = vsub.f32 %v1781_v56, %v3678_v29  ;;  %v3689_v56 = vld [vmem:[#allocation50_spill] sm:$0xff] }
 0x101   : > { %3664 = vst [vmem:[#allocation173_spill] sm:$0xff] %v2591_v21  ;;  %v2672_v1 = vand.u32 2147483647, %v3682_v18  ;;  %v3684_v21 = vld [vmem:[#allocation52_spill] sm:$0xff]  ;;  %v3691_v45 = vld [vmem:[#allocation38_spill] sm:$0xff] }
 0x102   : > { %v2623_v43 = vand.u32 2147483647, %v3669_v9  ;;  %3671 = vst [vmem:[#allocation28_spill] sm:$0xff] %v2626_v60  ;;  %v2643_v15 = vand.u32 2147483647, %v3674_v31  ;;  %v2646_v9 = vld [vmem:[%s1524_s23 + $0x3d0] sm:$0xff]  ;;  %v778_v26 = vadd.f32 %v3684_v21, %v3683_v63 }
 0x103   : > { %3672 = vst [vmem:[#allocation41_spill] sm:$0xff] %v2629_v2  ;;  %v2663_v32 = vand.u32 2147483647, %v3679_v57  ;;  %v3685_v57 = vld [vmem:[#allocation18_spill] sm:$0xff]  ;;  %v3686_v31 = vld [vmem:[#allocation57_spill] sm:$0xff]  ;;  %v3690_v2 = vsub.f32 %v1807_v49, %v3689_v56  ;;  %v3701_v56 = vld [vmem:[#allocation59_spill] sm:$0xff] }
 0x104   : > { %3670 = vst [vmem:[#allocation40_spill] sm:$0xff] %v2623_v43  ;;  %v2649_v43 = vld [vmem:[%s1530_s5 + $0x3c8] sm:$0xff]  ;;  %v3687_v21 = vld [vmem:[#allocation49_spill] sm:$0xff]  ;;  %v779_v24 = vadd.f32 %v778_v26, %v2117_v52  ;;  %v688_v7 = vand.u32 2147483647, %v3695_v25  ;;  %v3698_v52 = vld [vmem:[#allocation43_spill] sm:$0xff] }
 0x105   : > { %3675 = vst [vmem:[#allocation44_spill] sm:$0xff] %v2643_v15  ;;  %v799_v15 = vadd.f32 %v3686_v31, %v3685_v57  ;;  %v3688_v18 = vsub.f32 %v1804_v59, %v3687_v21  ;;  %v2697_v29 = vand.u32 2147483647, %v3690_v2  ;;  %v3692_v31 = vld [vmem:[#allocation51_spill] sm:$0xff]  ;;  %v3699_v26 = vld [vmem:[#allocation56_spill] sm:$0xff] }
 0x106   : > { %3676 = vst [vmem:[#allocation174_spill] sm:$0xff] %v2646_v9  ;;  %v3693_v57 = vsub.f32 %v3691_v45, %v3692_v31  ;;  %v3696_v59 = vld [vmem:[#allocation55_spill] sm:$0xff]  ;;  %v3700_v49 = vsub.f32 %v3698_v52, %v3699_v26  ;;  %v3702_v45 = vsub.f32 %v1859_v11, %v3701_v56  ;;  %v780_v42 = vadd.f32 %v779_v24, %v2349_v27  ;;  %v3703_v25 = vld [vmem:[#allocation60_spill] sm:$0xff]  ;;  %v3713_v56 = vld [vmem:[#allocation53_spill] sm:$0xff] }
 0x107   : > { %3677 = vst [vmem:[#allocation175_spill] sm:$0xff] %v2652_v61  ;;  %v2691_v63 = vand.u32 2147483647, %v3688_v18  ;;  %v800_v61 = vadd.f32 %v799_v15, %v2146_v23  ;;  %v3697_v21 = vsub.f32 %v1833_v0, %v3696_v59  ;;  %v3704_v23 = vsub.f32 %v1862_v51, %v3703_v25  ;;  %v3705_v0 = vld [vmem:[#allocation48_spill] sm:$0xff]  ;;  %v3714_v51 = vld [vmem:[#allocation67_spill] sm:$0xff] }
 0x108   : > { %v687_v60 = vand.u32 2147483647, %v3693_v57  ;;  %v2714_v2 = vand.u32 2147483647, %v3700_v49  ;;  %v2719_v31 = vand.u32 2147483647, %v3702_v45  ;;  %v3707_v57 = vsub.f32 %v3705_v0, %v3706_v47 }
 0x109   : > { %v2709_v18 = vand.u32 2147483647, %v3697_v21  ;;  %v2725_v15 = vand.u32 2147483647, %v3704_v23  ;;  %v3708_v21 = vld [vmem:[#allocation65_spill] sm:$0xff]  ;;  %v801_v11 = vadd.f32 %v800_v61, %v2378_v48  ;;  %v3711_v49 = vld [vmem:[#allocation66_spill] sm:$0xff]  ;;  %v3715_v45 = vsub.f32 %v3713_v56, %v3714_v51 }
 0x10a   : > { %v2730_v59 = vand.u32 2147483647, %v3707_v57  ;;  %v3709_v52 = vsub.f32 %v1888_v17, %v3708_v21  ;;  %v3712_v27 = vsub.f32 %v1891_v62, %v3711_v49  ;;  %v3716_v23 = vld [vmem:[#allocation71_spill] sm:$0xff]  ;;  %v781_v57 = vadd.f32 %v780_v42, %v679_v36  ;;  %v3718_v17 = vld [vmem:[#allocation72_spill] sm:$0xff]  ;;  %v3720_v48 = vld [vmem:[#allocation58_spill] sm:$0xff] }
 0x10b   : > { %v696_v25 = vand.u32 2147483647, %v3715_v45  ;;  %v3717_v0 = vsub.f32 %v1917_v38, %v3716_v23  ;;  %v3719_v21 = vsub.f32 %v1920_v8, %v3718_v17  ;;  %v3721_v61 = vld [vmem:[#allocation73_spill] sm:$0xff]  ;;  %v3723_v49 = vld [vmem:[#allocation78_spill] sm:$0xff]  ;;  %v802_v51 = vadd.f32 %v801_v11, %v680_v44  ;;  %v3726_v38 = vld [vmem:[#allocation63_spill] sm:$0xff] }
 0x10c   : > { %v2735_v26 = vand.u32 2147483647, %v3709_v52  ;;  %v695_v24 = vand.u32 2147483647, %v3712_v27  ;;  %v3722_v9 = vsub.f32 %v3720_v48, %v3721_v61  ;;  %v3724_v27 = vsub.f32 %v1946_v39, %v3723_v49  ;;  %v3727_v45 = vld [vmem:[#allocation79_spill] sm:$0xff]  ;;  %v3730_v42 = vld [vmem:[#allocation64_spill] sm:$0xff] }
 0x10d   : > { %v2747_v47 = vand.u32 2147483647, %v3717_v0  ;;  %v2752_v52 = vand.u32 2147483647, %v3719_v21  ;;  %v3728_v23 = vsub.f32 %v3726_v38, %v3727_v45  ;;  %v3731_v8 = vld [vmem:[#allocation80_spill] sm:$0xff]  ;;  %v782_v61 = vadd.f32 %v781_v57, %v687_v60  ;;  %v3737_v39 = vld [vmem:[#allocation85_spill] sm:$0xff] }
 0x10e   : > { %3710 = vst [vmem:[#allocation45_spill] sm:$0xff] %v2735_v26  ;;  %v2757_v62 = vand.u32 2147483647, %v3722_v9  ;;  %v2762_v56 = vand.u32 2147483647, %v3724_v27  ;;  %v3732_v0 = vsub.f32 %v3730_v42, %v3731_v8  ;;  %v3734_v21 = vld [vmem:[#allocation84_spill] sm:$0xff] }
 0x10f   : > { %v2767_v36 = vand.u32 2147483647, %v3728_v23  ;;  %v3735_v9 = vsub.f32 %v1975_v46, %v3734_v21  ;;  %v3736_v26 = vld [vmem:[#allocation69_spill] sm:$0xff]  ;;  %v3739_v44 = vld [vmem:[#allocation70_spill] sm:$0xff]  ;;  %v3743_v45 = vld [vmem:[#allocation75_spill] sm:$0xff] }
 0x110   : > { %3725 = vst [vmem:[#allocation33_spill] sm:$0xff] %v2762_v56  ;;  %v2772_v17 = vand.u32 2147483647, %v3732_v0  ;;  %v3738_v49 = vsub.f32 %v3736_v26, %v3737_v39  ;;  %v3740_v11 = vld [vmem:[#allocation86_spill] sm:$0xff]  ;;  %v3744_v23 = vld [vmem:[#allocation91_spill] sm:$0xff]  ;;  %v803_v0 = vadd.f32 %v802_v51, %v688_v7  ;;  %v3747_v46 = vld [vmem:[#allocation76_spill] sm:$0xff] }
 0x111   : > { %3729 = vst [vmem:[#allocation46_spill] sm:$0xff] %v2767_v36  ;;  %v703_v48 = vand.u32 2147483647, %v3735_v9  ;;  %v3741_v56 = vsub.f32 %v3739_v44, %v3740_v11  ;;  %v3745_v42 = vsub.f32 %v3743_v45, %v3744_v23  ;;  %v3748_v21 = vld [vmem:[#allocation92_spill] sm:$0xff]  ;;  %v3751_v26 = vld [vmem:[#allocation77_spill] sm:$0xff]  ;;  %v3757_v45 = vld [vmem:[#allocation82_spill] sm:$0xff] }
 0x112   : > { %3733 = vst [vmem:[#allocation14_spill] sm:$0xff] %v2772_v17  ;;  %v704_v27 = vand.u32 2147483647, %v3738_v49  ;;  %v3749_v60 = vsub.f32 %v3747_v46, %v3748_v21  ;;  %v3752_v9 = vld [vmem:[#allocation93_spill] sm:$0xff]  ;;  %v783_v17 = vadd.f32 %v782_v61, %v695_v24  ;;  %v3758_v23 = vld [vmem:[#allocation98_spill] sm:$0xff]  ;;  %v3761_v7 = vld [vmem:[#allocation83_spill] sm:$0xff] }
 0x113   : > { %v2783_v38 = vand.u32 2147483647, %v3741_v56  ;;  %v2788_v8 = vand.u32 2147483647, %v3745_v42  ;;  %v3753_v39 = vsub.f32 %v3751_v26, %v3752_v9  ;;  %v3755_v56 = vld [vmem:[#allocation100_spill] sm:$0xff]  ;;  %v3759_v42 = vsub.f32 %v3757_v45, %v3758_v23  ;;  %v3762_v51 = vld [vmem:[#allocation99_spill] sm:$0xff] }
 0x114   : > { %v2793_v57 = vand.u32 2147483647, %v3749_v60  ;;  %v3756_v44 = vsub.f32 %v2039_v19, %v3755_v56  ;;  %v3763_v46 = vsub.f32 %v3761_v7, %v3762_v51  ;;  %v3765_v60 = vld [vmem:[#allocation88_spill] sm:$0xff]  ;;  %v3772_v61 = vld [vmem:[#allocation90_spill] sm:$0xff] }
 0x115   : > { %3742 = vst [vmem:[#allocation52_spill] sm:$0xff] %v2783_v38  ;;  %v2798_v49 = vand.u32 2147483647, %v3753_v39  ;;  %v804_v39 = vadd.f32 %v803_v0, %v696_v25  ;;  %v3769_v19 = vld [vmem:[#allocation104_spill] sm:$0xff]  ;;  %v3780_v25 = vld [vmem:[#allocation95_spill] sm:$0xff]  ;;  %v3781_v0 = vld [vmem:[#allocation109_spill] sm:$0xff] }
 0x116   : > { %3746 = vst [vmem:[#allocation18_spill] sm:$0xff] %v2788_v8  ;;  %v711_v11 = vand.u32 2147483647, %v3756_v44  ;;  %v2806_v8 = vand.u32 2147483647, %v3759_v42  ;;  %v3773_v44 = vld [vmem:[#allocation105_spill] sm:$0xff] }
 0x117   : > { %3750 = vst [vmem:[#allocation57_spill] sm:$0xff] %v2793_v57  ;;  %v2811_v21 = vand.u32 2147483647, %v3763_v46  ;;  %v3766_v57 = vld [vmem:[#allocation103_spill] sm:$0xff]  ;;  %v3774_v45 = vsub.f32 %v3772_v61, %v3773_v44  ;;  %v3776_v42 = vld [vmem:[#allocation117_spill] sm:$0xff]  ;;  %v784_v46 = vadd.f32 %v783_v17, %v703_v48  ;;  %v3788_v44 = vld [vmem:[#allocation102_spill] sm:$0xff]  ;;  %v805_v17 = vadd.f32 %v804_v39, %v704_v27 }
 0x118   : > { %3754 = vst [vmem:[#allocation49_spill] sm:$0xff] %v2798_v49  ;;  %v3767_v26 = vsub.f32 %v3765_v60, %v3766_v57  ;;  %v3768_v49 = vld [vmem:[#allocation89_spill] sm:$0xff]  ;;  %v3777_v7 = vsub.f32 %v2123_v12, %v3776_v42  ;;  %v2830_v57 = vld [vmem:[%s1524_s23 + $0x3d8] sm:$0xff]  ;;  %v3792_v42 = vld [vmem:[#allocation111_spill] sm:$0xff] }
 0x119   : > { %3760 = vst [vmem:[#allocation50_spill] sm:$0xff] %v2806_v8  ;;  %v3770_v56 = vsub.f32 %v3768_v49, %v3769_v19  ;;  %v2824_v23 = vand.u32 2147483647, %v3774_v45  ;;  %v2833_v60 = vld [vmem:[%s1530_s5 + $0x3d8] sm:$0xff]  ;;  %v3782_v49 = vsub.f32 %v3780_v25, %v3781_v0  ;;  %v3784_v19 = vld [vmem:[#allocation96_spill] sm:$0xff]  ;;  %v3791_v48 = vld [vmem:[#allocation97_spill] sm:$0xff] }
 0x11a   : > { %3764 = vst [vmem:[#allocation38_spill] sm:$0xff] %v2811_v21  ;;  %v712_v9 = vand.u32 2147483647, %v3767_v26  ;;  %v719_v51 = vand.u32 2147483647, %v3777_v7  ;;  %v3789_v45 = vld [vmem:[#allocation118_spill] sm:$0xff]  ;;  %v3793_v7 = vsub.f32 %v3791_v48, %v3792_v42 }
 0x11b   : > { %v2819_v24 = vand.u32 2147483647, %v3770_v56  ;;  %3775 = vst [vmem:[#allocation54_spill] sm:$0xff] %v2824_v23  ;;  %v2838_v26 = vand.u32 2147483647, %v3782_v49  ;;  %v3785_v56 = vld [vmem:[#allocation110_spill] sm:$0xff]  ;;  %v3790_v23 = vsub.f32 %v3788_v44, %v3789_v45 }
 0x11c   : > { %3778 = vst [vmem:[#allocation55_spill] sm:$0xff] %v2830_v57  ;;  %v3786_v21 = vsub.f32 %v3784_v19, %v3785_v56  ;;  %v3795_v8 = vld [vmem:[#allocation101_spill] sm:$0xff]  ;;  %v3796_v25 = vld [vmem:[#allocation116_spill] sm:$0xff]  ;;  %v2864_v44 = vld [vmem:[%s1524_s23 + $0x3e0] sm:$0xff] }
 0x11d   : > { %3771 = vst [vmem:[#allocation51_spill] sm:$0xff] %v2819_v24  ;;  %v720_v12 = vand.u32 2147483647, %v3790_v23  ;;  %v2851_v24 = vand.u32 2147483647, %v3793_v7  ;;  %v3797_v0 = vsub.f32 %v3795_v8, %v3796_v25  ;;  %v3800_v19 = vld [vmem:[#allocation121_spill] sm:$0xff] }
 0x11e   : > { %3779 = vst [vmem:[#allocation43_spill] sm:$0xff] %v2833_v60  ;;  %v2843_v61 = vand.u32 2147483647, %v3786_v21  ;;  %v2867_v23 = vld [vmem:[%s1530_s5 + $0x3e0] sm:$0xff]  ;;  %v3805_v39 = vld [vmem:[#allocation122_spill] sm:$0xff]  ;;  %v3808_v42 = vld [vmem:[#allocation17_spill] sm:$0xff] }
 0x11f   : > { %3783 = vst [vmem:[#allocation56_spill] sm:$0xff] %v2838_v26  ;;  %v2856_v49 = vand.u32 2147483647, %v3797_v0  ;;  %v3799_v26 = vld [vmem:[#allocation106_spill] sm:$0xff]  ;;  %v3804_v27 = vld [vmem:[#allocation107_spill] sm:$0xff]  ;;  %v3809_v7 = vld [vmem:[#allocation132_spill] sm:$0xff] }
 0x120   : > { %3787 = vst [vmem:[#allocation59_spill] sm:$0xff] %v2843_v61  ;;  %v3801_v21 = vsub.f32 %v3799_v26, %v3800_v19  ;;  %v785_v61 = vadd.f32 %v784_v46, %v711_v11  ;;  %v3806_v45 = vsub.f32 %v3804_v27, %v3805_v39  ;;  %v3810_v8 = vsub.f32 %v3808_v42, %v3809_v7  ;;  %v3811_v0 = vld [vmem:[#allocation119_spill] sm:$0xff]  ;;  %v3814_v46 = vld [vmem:[#allocation108_spill] sm:$0xff]  ;;  %v3818_v27 = vld [vmem:[#allocation113_spill] sm:$0xff] }
 0x121   : > { %3794 = vst [vmem:[#allocation60_spill] sm:$0xff] %v2851_v24  ;;  %v806_v11 = vadd.f32 %v805_v17, %v712_v9  ;;  %v3815_v19 = vld [vmem:[#allocation123_spill] sm:$0xff]  ;;  %v3821_v42 = vld [vmem:[#allocation114_spill] sm:$0xff]  ;;  %v3822_v7 = vld [vmem:[#allocation128_spill] sm:$0xff] }
 0x122   : > { %3798 = vst [vmem:[#allocation48_spill] sm:$0xff] %v2856_v49  ;;  %v2861_v56 = vand.u32 2147483647, %v3801_v21  ;;  %v2872_v48 = vand.u32 2147483647, %v3806_v45  ;;  %v3812_v49 = vld [vmem:[#allocation133_spill] sm:$0xff]  ;;  %v3816_v21 = vsub.f32 %v3814_v46, %v3815_v19 }
 0x123   : > { %3803 = vst [vmem:[#allocation65_spill] sm:$0xff] %v2867_v23  ;;  %v727_v25 = vand.u32 2147483647, %v3810_v8  ;;  %v3813_v24 = vsub.f32 %v3811_v0, %v3812_v49  ;;  %v3819_v39 = vld [vmem:[#allocation127_spill] sm:$0xff]  ;;  %v3823_v8 = vsub.f32 %v3821_v42, %v3822_v7  ;;  %v786_v49 = vadd.f32 %v785_v61, %v719_v51  ;;  %v3826_v17 = vld [vmem:[#allocation129_spill] sm:$0xff]  ;;  %v3829_v19 = vld [vmem:[#allocation120_spill] sm:$0xff] }
 0x124   : > { %3802 = vst [vmem:[#allocation61_spill] sm:$0xff] %v2861_v56  ;;  %v2883_v56 = vand.u32 2147483647, %v3816_v21  ;;  %v3820_v45 = vsub.f32 %v3818_v27, %v3819_v39  ;;  %v3825_v9 = vld [vmem:[#allocation115_spill] sm:$0xff]  ;;  %v3830_v21 = vld [vmem:[#allocation134_spill] sm:$0xff]  ;;  %v3833_v27 = vsub.f32 %v2294_v10, %v2361_v22  ;;  %v3834_v61 = vld [vmem:[#allocation124_spill] sm:$0xff] }
 0x125   : > { %3807 = vst [vmem:[#allocation66_spill] sm:$0xff] %v2872_v48  ;;  %v728_v26 = vand.u32 2147483647, %v3813_v24  ;;  %v2893_v38 = vand.u32 2147483647, %v3823_v8  ;;  %v2896_v24 = vld [vmem:[%s1524_s23 + $0x3e8] sm:$0xff]  ;;  %v3827_v0 = vsub.f32 %v3825_v9, %v3826_v17 }
 0x126   : > { %3817 = vst [vmem:[#allocation53_spill] sm:$0xff] %v2883_v56  ;;  %v2888_v48 = vand.u32 2147483647, %v3820_v45  ;;  %v3831_v56 = vsub.f32 %v3829_v19, %v3830_v21  ;;  %v736_v39 = vand.u32 2147483647, %v3833_v27  ;;  %v807_v45 = vadd.f32 %v806_v11, %v720_v12  ;;  %v3835_v42 = vld [vmem:[#allocation136_spill] sm:$0xff] }
 0x127   : > { %3824 = vst [vmem:[#allocation67_spill] sm:$0xff] %v2893_v38  ;;  %v2901_v46 = vand.u32 2147483647, %v3827_v0  ;;  %v3836_v7 = vsub.f32 %v3834_v61, %v3835_v42  ;;  %v3838_v9 = vld [vmem:[#allocation125_spill] sm:$0xff]  ;;  %v3842_v19 = vld [vmem:[#allocation126_spill] sm:$0xff]  ;;  %v2932_v11 = vld [vmem:[%s1530_s5 + $0x3e8] sm:$0xff] }
 0x128   : > { %v2906_v36 = vand.u32 2147483647, %v3831_v56  ;;  %v3839_v17 = vld [vmem:[#allocation137_spill] sm:$0xff]  ;;  %v3843_v21 = vld [vmem:[#allocation138_spill] sm:$0xff]  ;;  %v3848_v42 = vld [vmem:[#allocation143_spill] sm:$0xff] }
 0x129   : > { %3828 = vst [vmem:[#allocation71_spill] sm:$0xff] %v2901_v46  ;;  %v2916_v8 = vand.u32 2147483647, %v3836_v7  ;;  %v3840_v0 = vsub.f32 %v3838_v9, %v3839_v17  ;;  %v3844_v22 = vsub.f32 %v3842_v19, %v3843_v21  ;;  %v2929_v12 = vld [vmem:[%s1524_s23 + $0x3f0] sm:$0xff]  ;;  %v3851_v46 = vld [vmem:[#allocation131_spill] sm:$0xff]  ;;  %v3854_v21 = vld [vmem:[#allocation130_spill] sm:$0xff] }
 0x12a   : > { %3832 = vst [vmem:[#allocation72_spill] sm:$0xff] %v2906_v36  ;;  %v2935_v27 = vld [vmem:[%s1530_s5 + $0x3f0] sm:$0xff]  ;;  %v3858_v60 = vld [vmem:[#allocation22_spill] sm:$0xff]  ;;  %v3859_v57 = vld [vmem:[#allocation147_spill] sm:$0xff] }
 0x12b   : > { %3837 = vst [vmem:[#allocation58_spill] sm:$0xff] %v2916_v8  ;;  %v2921_v56 = vand.u32 2147483647, %v3840_v0  ;;  %v2926_v10 = vand.u32 2147483647, %v3844_v22  ;;  %v3847_v61 = vld [vmem:[#allocation21_spill] sm:$0xff]  ;;  %v808_v8 = vadd.f32 %v807_v45, %v728_v26  ;;  %v3860_v38 = vsub.f32 %v3858_v60, %v3859_v57 }
 0x12c   : > { %3846 = vst [vmem:[#allocation63_spill] sm:$0xff] %v2935_v27  ;;  %v3849_v7 = vsub.f32 %v3847_v61, %v3848_v42  ;;  %v3852_v9 = vld [vmem:[#allocation145_spill] sm:$0xff]  ;;  %v3855_v22 = vld [vmem:[#allocation144_spill] sm:$0xff]  ;;  %v3862_v42 = vld [vmem:[#allocation135_spill] sm:$0xff] }
 0x12d   : > { %3841 = vst [vmem:[#allocation73_spill] sm:$0xff] %v2921_v56  ;;  %v3853_v17 = vsub.f32 %v3851_v46, %v3852_v9  ;;  %v787_v56 = vadd.f32 %v786_v49, %v727_v25  ;;  %v2955_v61 = vand.u32 2147483647, %v3860_v38  ;;  %v2963_v25 = vld [vmem:[%s1524_s23 + $0x3f8] sm:$0xff]  ;;  %v3868_v49 = vld [vmem:[#allocation140_spill] sm:$0xff]  ;;  %v3869_v45 = vld [vmem:[#allocation149_spill] sm:$0xff] }
 0x12e   : > { %3845 = vst [vmem:[#allocation78_spill] sm:$0xff] %v2926_v10  ;;  %v2940_v51 = vand.u32 2147483647, %v3849_v7  ;;  %v3856_v10 = vsub.f32 %v3854_v21, %v3855_v22  ;;  %v3863_v7 = vld [vmem:[#allocation148_spill] sm:$0xff]  ;;  %v2966_v26 = vld [vmem:[%s1530_s5 + $0x3f8] sm:$0xff]  ;;  %v3870_v9 = vsub.f32 %v3868_v49, %v3869_v45  ;;  %v3877_v60 = vld [vmem:[#allocation157_spill] sm:$0xff] }
 0x12f   : > { %v735_v0 = vand.u32 2147483647, %v3853_v17  ;;  %3861 = vst [vmem:[#allocation80_spill] sm:$0xff] %v2955_v61  ;;  %v3873_v21 = vld [vmem:[#allocation150_spill] sm:$0xff]  ;;  %v3882_v49 = vld [vmem:[#allocation15_spill] sm:$0xff] }
 0x130   : > { %3850 = vst [vmem:[#allocation79_spill] sm:$0xff] %v2940_v51  ;;  %v2950_v36 = vand.u32 2147483647, %v3856_v10  ;;  %v3864_v51 = vsub.f32 %v3862_v42, %v3863_v7  ;;  %v2971_v17 = vand.u32 2147483647, %v3870_v9  ;;  %v3872_v10 = vld [vmem:[#allocation141_spill] sm:$0xff] }
 0x131   : > { %3866 = vst [vmem:[#allocation69_spill] sm:$0xff] %v2963_v25  ;;  %v3874_v22 = vsub.f32 %v3872_v10, %v3873_v21  ;;  %v3876_v38 = vld [vmem:[#allocation146_spill] sm:$0xff]  ;;  %v3883_v45 = vld [vmem:[#allocation155_spill] sm:$0xff]  ;;  %v3886_v10 = vld [vmem:[#allocation25_spill] sm:$0xff] }
 0x132   : > { %3857 = vst [vmem:[#allocation64_spill] sm:$0xff] %v2950_v36  ;;  %v2960_v46 = vand.u32 2147483647, %v3864_v51  ;;  %v3878_v19 = vsub.f32 %v3876_v38, %v3877_v60  ;;  %v809_v51 = vadd.f32 %v808_v8, %v736_v39  ;;  %v3879_v36 = vld [vmem:[#allocation142_spill] sm:$0xff]  ;;  %v3884_v9 = vsub.f32 %v3882_v49, %v3883_v45  ;;  %v3887_v21 = vld [vmem:[#allocation156_spill] sm:$0xff] }
 0x133   : > { %3867 = vst [vmem:[#allocation85_spill] sm:$0xff] %v2966_v26  ;;  %v2976_v57 = vand.u32 2147483647, %v3874_v22  ;;  %v3888_v22 = vsub.f32 %v3886_v10, %v3887_v21  ;;  %v3889_v39 = vsub.f32 %v2381_v14, %v2448_v3  ;;  %v3891_v38 = vld [vmem:[#allocation160_spill] sm:$0xff]  ;;  %v788_v45 = vadd.f32 %v787_v56, %v735_v0  ;;  %v3898_v21 = vld [vmem:[#allocation162_spill] sm:$0xff]  ;;  %v3901_v14 = vld [vmem:[#allocation153_spill] sm:$0xff] }
 0x134   : > { %3865 = vst [vmem:[#allocation84_spill] sm:$0xff] %v2960_v46  ;;  %v744_v42 = vand.u32 2147483647, %v3878_v19  ;;  %v3880_v46 = vld [vmem:[#allocation151_spill] sm:$0xff]  ;;  %v3890_v19 = vld [vmem:[#allocation16_spill] sm:$0xff]  ;;  %v3908_v56 = vsub.f32 %v2439_v28, %v2506_v34  ;;  %v3916_v34 = vsub.f32 %v2471_v5, %v2538_v54  ;;  %v3934_v26 = vld [vmem:[#allocation74_spill] sm:$0xff] }
 0x135   : > { %3871 = vst [vmem:[#allocation70_spill] sm:$0xff] %v2971_v17  ;;  %v3881_v61 = vsub.f32 %v3879_v36, %v3880_v46  ;;  %v2991_v17 = vand.u32 2147483647, %v3884_v9  ;;  %v2999_v8 = vand.u32 2147483647, %v3889_v39  ;;  %v3892_v60 = vsub.f32 %v3890_v19, %v3891_v38  ;;  %v3895_v46 = vld [vmem:[#allocation161_spill] sm:$0xff] }
 0x136   : > { %3875 = vst [vmem:[#allocation86_spill] sm:$0xff] %v2976_v57  ;;  %v743_v57 = vand.u32 2147483647, %v3888_v22  ;;  %v3897_v10 = vld [vmem:[#allocation152_spill] sm:$0xff]  ;;  %v3902_v39 = vld [vmem:[#allocation163_spill] sm:$0xff]  ;;  %v3904_v38 = vld [vmem:[#allocation154_spill] sm:$0xff] }
 0x137   : > { %v2986_v23 = vand.u32 2147483647, %v3881_v61  ;;  %3885 = vst [vmem:[#allocation75_spill] sm:$0xff] %v2991_v17  ;;  %v3004_v36 = vand.u32 2147483647, %v3892_v60  ;;  %v3894_v61 = vld [vmem:[#allocation26_spill] sm:$0xff]  ;;  %v3899_v22 = vsub.f32 %v3897_v10, %v3898_v21  ;;  %v3903_v17 = vsub.f32 %v3901_v14, %v3902_v39 }
 0x138   : > { %v3896_v7 = vsub.f32 %v3894_v61, %v3895_v46  ;;  %v3905_v60 = vld [vmem:[#allocation164_spill] sm:$0xff]  ;;  %v751_v0 = vand.u32 2147483647, %v3908_v56  ;;  %v3910_v46 = vld [vmem:[#allocation166_spill] sm:$0xff]  ;;  %v3912_v21 = vld [vmem:[#allocation159_spill] sm:$0xff] }
 0x139   : > { %3893 = vst [vmem:[#allocation91_spill] sm:$0xff] %v3004_v36  ;;  %v3016_v3 = vand.u32 2147483647, %v3899_v22  ;;  %v3021_v19 = vand.u32 2147483647, %v3903_v17  ;;  %v3906_v36 = vsub.f32 %v3904_v38, %v3905_v60  ;;  %v3913_v22 = vld [vmem:[#allocation167_spill] sm:$0xff]  ;;  %v810_v17 = vadd.f32 %v809_v51, %v744_v42 }
 0x13a   : > { %v3009_v49 = vand.u32 2147483647, %v3896_v7  ;;  %v3909_v7 = vld [vmem:[#allocation158_spill] sm:$0xff]  ;;  %v3049_v28 = vand.u32 2147483647, %v3916_v34  ;;  %v3918_v38 = vld [vmem:[#allocation169_spill] sm:$0xff]  ;;  %v3920_v42 = vsub.f32 %v2497_v41, %v2561_v50 }
 0x13b   : > { %3900 = vst [vmem:[#allocation76_spill] sm:$0xff] %v3016_v3  ;;  %v3026_v61 = vand.u32 2147483647, %v3906_v36  ;;  %v3911_v9 = vsub.f32 %v3909_v7, %v3910_v46  ;;  %v3914_v3 = vsub.f32 %v3912_v21, %v3913_v22  ;;  %v3915_v36 = vsub.f32 %v2468_v40, %v2535_v6  ;;  %v3924_v7 = vld [vmem:[#allocation165_spill] sm:$0xff]  ;;  %v3925_v46 = vld [vmem:[#allocation170_spill] sm:$0xff]  ;;  %v3927_v22 = vld [vmem:[#allocation172_spill] sm:$0xff] }
 0x13c   : > { %v3059_v51 = vand.u32 2147483647, %v3920_v42  ;;  %v3926_v5 = vsub.f32 %v3924_v7, %v3925_v46  ;;  %v789_v21 = vadd.f32 %v788_v45, %v743_v57  ;;  %v3931_v41 = vld [vmem:[#allocation27_spill] sm:$0xff]  ;;  %v3932_v50 = vld [vmem:[#allocation68_spill] sm:$0xff]  ;;  %v3939_v57 = vld [vmem:[#allocation37_spill] sm:$0xff] }
 0x13d   : > { %3907 = vst [vmem:[#allocation92_spill] sm:$0xff] %v3026_v61  ;;  %v752_v10 = vand.u32 2147483647, %v3911_v9  ;;  %v3037_v27 = vand.u32 2147483647, %v3914_v3  ;;  %v3917_v9 = vld [vmem:[#allocation31_spill] sm:$0xff]  ;;  %v841_v42 = vadd.f32 %v3932_v50, %v3931_v41 }
 0x13e   : > { %v3044_v39 = vand.u32 2147483647, %v3915_v36  ;;  %v3919_v60 = vsub.f32 %v3917_v9, %v3918_v38  ;;  %v3921_v3 = vld [vmem:[#allocation36_spill] sm:$0xff]  ;;  %v759_v54 = vand.u32 2147483647, %v3926_v5  ;;  %v3928_v36 = vsub.f32 %v2526_v20, %v3927_v22  ;;  %v3929_v9 = vld [vmem:[#allocation23_spill] sm:$0xff] }
 0x13f   : > { %v3922_v40 = vsub.f32 %v2500_v58, %v3921_v3  ;;  %v3930_v38 = vld [vmem:[#allocation62_spill] sm:$0xff]  ;;  %v3933_v14 = vld [vmem:[#allocation32_spill] sm:$0xff]  ;;  %v811_v7 = vadd.f32 %v810_v17, %v752_v10  ;;  %v3940_v45 = vld [vmem:[#allocation81_spill] sm:$0xff] }
 0x140   : > { %v3054_v56 = vand.u32 2147483647, %v3919_v60  ;;  %v760_v34 = vand.u32 2147483647, %v3928_v36  ;;  %v820_v60 = vadd.f32 %v3930_v38, %v3929_v9  ;;  %v862_v58 = vadd.f32 %v3934_v26, %v3933_v14  ;;  %v3935_v3 = vld [vmem:[#allocation168_spill] sm:$0xff]  ;;  %v3941_v20 = vld [vmem:[#allocation42_spill] sm:$0xff] }
 0x141   : > { %v3064_v6 = vand.u32 2147483647, %v3922_v40  ;;  %v3936_v40 = vld [vmem:[#allocation173_spill] sm:$0xff]  ;;  %v883_v46 = vadd.f32 %v3940_v45, %v3939_v57  ;;  %v3942_v5 = vld [vmem:[#allocation87_spill] sm:$0xff]  ;;  %v3943_v36 = vsub.f32 %v2532_v37, %v2594_v13  ;;  %v3944_v38 = vld [vmem:[#allocation112_spill] sm:$0xff] }
 0x142   : > { %v904_v22 = vadd.f32 %v3942_v5, %v3941_v20  ;;  %v821_v41 = vadd.f32 %v820_v60, %v3944_v38  ;;  %v3945_v26 = vld [vmem:[#allocation11_spill] sm:$0xff]  ;;  %v3946_v50 = vld [vmem:[#allocation20_spill] sm:$0xff]  ;;  %v3948_v17 = vld [vmem:[#allocation13_spill] sm:$0xff]  ;;  %v3951_v20 = vsub.f32 %v2606_v33, %v2649_v43 }
 0x143   : > { %3923 = vst [vmem:[#allocation77_spill] sm:$0xff] %v3064_v6  ;;  %v3937_v6 = vsub.f32 %v3935_v3, %v3936_v40  ;;  %v3090_v9 = vand.u32 2147483647, %v3943_v36  ;;  %v842_v14 = vadd.f32 %v841_v42, %v3945_v26  ;;  %v863_v3 = vadd.f32 %v862_v58, %v3946_v50  ;;  %v3947_v40 = vld [vmem:[#allocation12_spill] sm:$0xff]  ;;  %v3949_v57 = vld [vmem:[#allocation47_spill] sm:$0xff]  ;;  %v3950_v45 = vld [vmem:[#allocation94_spill] sm:$0xff] }
 0x144   : > { %v884_v10 = vadd.f32 %v883_v46, %v3947_v40  ;;  %v925_v61 = vadd.f32 %v3950_v45, %v3949_v57  ;;  %v768_v37 = vand.u32 2147483647, %v3951_v20  ;;  %v3952_v13 = vld [vmem:[#allocation29_spill] sm:$0xff]  ;;  %v3953_v36 = vld [vmem:[#allocation30_spill] sm:$0xff]  ;;  %v3954_v38 = vld [vmem:[#allocation19_spill] sm:$0xff]  ;;  %v812_v26 = vadd.f32 %v811_v7, %v760_v34 }
 0x145   : > { %v3081_v25 = vand.u32 2147483647, %v3937_v6  ;;  %v790_v6 = vadd.f32 %v789_v21, %v751_v0  ;;  %v822_v5 = vadd.f32 %v821_v41, %v3952_v13  ;;  %v843_v60 = vadd.f32 %v842_v14, %v3953_v36  ;;  %v3955_v58 = vld [vmem:[#allocation34_spill] sm:$0xff]  ;;  %v3956_v21 = vld [vmem:[#allocation35_spill] sm:$0xff]  ;;  %v3959_v43 = vld [vmem:[#allocation40_spill] sm:$0xff] }
 0x146   : > { %v864_v42 = vadd.f32 %v863_v3, %v3954_v38  ;;  %v885_v0 = vadd.f32 %v884_v10, %v3955_v58  ;;  %v3957_v50 = vld [vmem:[#allocation139_spill] sm:$0xff]  ;;  %v3958_v40 = vsub.f32 %v2555_v4, %v2609_v55  ;;  %v3960_v57 = vld [vmem:[#allocation44_spill] sm:$0xff]  ;;  %v3961_v34 = vsub.f32 %v2585_v53, %v2632_v30  ;;  %v3968_v36 = vld [vmem:[#allocation46_spill] sm:$0xff] }
 0x147   : > { %3938 = vst [vmem:[#allocation93_spill] sm:$0xff] %v3081_v25  ;;  %v905_v25 = vadd.f32 %v904_v22, %v3948_v17  ;;  %v926_v22 = vadd.f32 %v925_v61, %v3957_v50  ;;  %v823_v33 = vadd.f32 %v822_v5, %v3959_v43  ;;  %v844_v41 = vadd.f32 %v843_v60, %v3960_v57  ;;  %v3962_v61 = vld [vmem:[#allocation24_spill] sm:$0xff]  ;;  %v3969_v60 = vld [vmem:[#allocation45_spill] sm:$0xff]  ;;  %v3976_v43 = vld [vmem:[#allocation171_spill] sm:$0xff] }
 0x148   : > { %v3111_v17 = vand.u32 2147483647, %v3958_v40  ;;  %v865_v14 = vadd.f32 %v864_v42, %v2663_v32  ;;  %v767_v7 = vand.u32 2147483647, %v3961_v34  ;;  %v886_v3 = vadd.f32 %v885_v0, %v2672_v1  ;;  %v3972_v58 = vld [vmem:[#allocation57_spill] sm:$0xff] }
 0x149   : > { %v906_v46 = vadd.f32 %v905_v25, %v3956_v21  ;;  %v927_v10 = vadd.f32 %v926_v22, %v3962_v61  ;;  %v791_v45 = vadd.f32 %v790_v6, %v759_v54  ;;  %v824_v55 = vadd.f32 %v823_v33, %v2709_v18  ;;  %v3964_v54 = vld [vmem:[#allocation39_spill] sm:$0xff]  ;;  %v3975_v22 = vld [vmem:[#allocation14_spill] sm:$0xff]  ;;  %v3977_v33 = vld [vmem:[#allocation41_spill] sm:$0xff] }
 0x14a   : > { %v845_v4 = vadd.f32 %v844_v41, %v2714_v2  ;;  %v866_v20 = vadd.f32 %v865_v14, %v2719_v31  ;;  %v813_v13 = vadd.f32 %v812_v26, %v768_v37  ;;  %v887_v32 = vadd.f32 %v886_v3, %v2725_v15  ;;  %v3965_v31 = vld [vmem:[#allocation28_spill] sm:$0xff]  ;;  %v3967_v15 = vld [vmem:[#allocation33_spill] sm:$0xff]  ;;  %v3971_v26 = vld [vmem:[#allocation18_spill] sm:$0xff] }
 0x14b   : > { %v907_v25 = vadd.f32 %v906_v46, %v2691_v63  ;;  %v928_v30 = vadd.f32 %v927_v10, %v2697_v29  ;;  %v3963_v53 = vsub.f32 %v2558_v35, %v2612_v16  ;;  %v825_v63 = vadd.f32 %v824_v55, %v2747_v47  ;;  %v3970_v35 = vld [vmem:[#allocation52_spill] sm:$0xff]  ;;  %v3974_v46 = vld [vmem:[#allocation50_spill] sm:$0xff]  ;;  %v3979_v14 = vld [vmem:[#allocation51_spill] sm:$0xff] }
 0x14c   : > { %v846_v18 = vadd.f32 %v845_v4, %v2752_v52  ;;  %v867_v2 = vadd.f32 %v866_v20, %v2757_v62  ;;  %v3966_v6 = vsub.f32 %v3964_v54, %v3965_v31  ;;  %v792_v16 = vadd.f32 %v791_v45, %v767_v7  ;;  %v3973_v62 = vld [vmem:[#allocation49_spill] sm:$0xff]  ;;  %v3980_v7 = vld [vmem:[#allocation54_spill] sm:$0xff]  ;;  %v3983_v45 = vld [vmem:[#allocation175_spill] sm:$0xff] }
 0x14d   : > { %v908_v5 = vadd.f32 %v907_v25, %v2730_v59  ;;  %v3131_v1 = vand.u32 2147483647, %v3963_v53  ;;  %v888_v59 = vadd.f32 %v887_v32, %v3967_v15  ;;  %v929_v38 = vadd.f32 %v928_v30, %v3969_v60  ;;  %v3981_v25 = vld [vmem:[#allocation56_spill] sm:$0xff]  ;;  %v3982_v10 = vld [vmem:[#allocation174_spill] sm:$0xff]  ;;  %v3985_v20 = vld [vmem:[#allocation59_spill] sm:$0xff] }
 0x14e   : > { %v3139_v37 = vand.u32 2147483647, %v3966_v6  ;;  %v826_v42 = vadd.f32 %v825_v63, %v3970_v35  ;;  %v847_v47 = vadd.f32 %v846_v18, %v3971_v26  ;;  %v868_v52 = vadd.f32 %v867_v2, %v3972_v58  ;;  %v3987_v53 = vld [vmem:[#allocation38_spill] sm:$0xff]  ;;  %v3988_v2 = vld [vmem:[#allocation61_spill] sm:$0xff]  ;;  %v3991_v60 = vld [vmem:[#allocation67_spill] sm:$0xff] }
 0x14f   : > { %v909_v29 = vadd.f32 %v908_v5, %v3968_v36  ;;  %v814_v0 = vrot.slane %v813_v13, 4  ;;  %v889_v21 = vadd.f32 %v888_v59, %v3973_v62  ;;  %v930_v40 = vadd.f32 %v929_v38, %v3975_v22  ;;  %v3986_v5 = vld [vmem:[#allocation60_spill] sm:$0xff]  ;;  %v3989_v31 = vld [vmem:[#allocation66_spill] sm:$0xff]  ;;  %v3990_v15 = vld [vmem:[#allocation53_spill] sm:$0xff] }
 0x150   : > { %v3978_v57 = vsub.f32 %v3976_v43, %v3977_v33  ;;  %v827_v34 = vadd.f32 %v826_v42, %v3979_v14  ;;  %v848_v3 = vadd.f32 %v847_v47, %v3980_v7  ;;  %v869_v61 = vadd.f32 %v868_v52, %v3981_v25  ;;  %v3992_v35 = vld [vmem:[#allocation48_spill] sm:$0xff]  ;;  %v3993_v26 = vld [vmem:[#allocation55_spill] sm:$0xff]  ;;  %v3998_v22 = vld [vmem:[#allocation73_spill] sm:$0xff] }
 0x151   : > { %v910_v50 = vadd.f32 %v909_v29, %v3974_v46  ;;  %v3984_v55 = vsub.f32 %v3982_v10, %v3983_v45  ;;  %v890_v32 = vadd.f32 %v889_v21, %v3985_v20  ;;  %v931_v63 = vadd.f32 %v930_v40, %v3987_v53  ;;  %v3994_v47 = vld [vmem:[#allocation43_spill] sm:$0xff]  ;;  %v3996_v62 = vld [vmem:[#allocation72_spill] sm:$0xff]  ;;  %v3997_v46 = vld [vmem:[#allocation58_spill] sm:$0xff] }
 0x152   : > { %v766_v41 = vand.u32 2147483647, %v3978_v57  ;;  %v793_v18 = vrot.slane %v792_v16, 4  ;;  %v828_v54 = vadd.f32 %v827_v34, %v3988_v2  ;;  %v849_v6 = vadd.f32 %v848_v3, %v3989_v31  ;;  %v3999_v43 = vld [vmem:[#allocation65_spill] sm:$0xff]  ;;  %v4002_v57 = vld [vmem:[#allocation79_spill] sm:$0xff]  ;;  %v4004_v25 = vld [vmem:[#allocation80_spill] sm:$0xff] }
 0x153   : > { %v769_v4 = vand.u32 2147483647, %v3984_v55  ;;  %v911_v30 = vadd.f32 %v910_v50, %v3986_v5  ;;  %v870_v59 = vadd.f32 %v869_v61, %v3990_v15  ;;  %v815_v36 = vadd.f32 %v814_v0, %v813_v13  ;;  %v4001_v0 = vld [vmem:[#allocation78_spill] sm:$0xff]  ;;  %v4003_v34 = vld [vmem:[#allocation71_spill] sm:$0xff]  ;;  %v4005_v10 = vld [vmem:[#allocation84_spill] sm:$0xff] }
 0x154   : > { %v891_v29 = vadd.f32 %v890_v32, %v2888_v48  ;;  %v932_v42 = vadd.f32 %v931_v63, %v3992_v35  ;;  %v3995_v58 = vsub.f32 %v3993_v26, %v3994_v47  ;;  %v829_v21 = vadd.f32 %v828_v54, %v3996_v62  ;;  %v4006_v55 = vld [vmem:[#allocation70_spill] sm:$0xff]  ;;  %v4011_v15 = vld [vmem:[#allocation63_spill] sm:$0xff] }
 0x155   : > { %v912_v38 = vadd.f32 %v911_v30, %v3991_v60  ;;  %v850_v50 = vadd.f32 %v849_v6, %v3997_v46  ;;  %v871_v40 = vadd.f32 %v870_v59, %v3998_v22  ;;  %v4000_v33 = vsub.f32 %v2864_v44, %v3999_v43  ;;  %v4007_v5 = vld [vmem:[#allocation86_spill] sm:$0xff]  ;;  %v4008_v44 = vld [vmem:[#allocation64_spill] sm:$0xff]  ;;  %v4014_v35 = vld [vmem:[#allocation75_spill] sm:$0xff] }
 0x156   : > { %v770_v52 = vand.u32 2147483647, %v3995_v58  ;;  %v892_v48 = vadd.f32 %v891_v29, %v4001_v0  ;;  %v933_v7 = vadd.f32 %v932_v42, %v4003_v34  ;;  %v794_v3 = vadd.f32 %v793_v18, %v792_v16  ;;  %v4010_v16 = vld [vmem:[#allocation91_spill] sm:$0xff]  ;;  %v4013_v60 = vld [vmem:[#allocation76_spill] sm:$0xff]  ;;  %v4017_v22 = vld [vmem:[#allocation69_spill] sm:$0xff] }
 0x157   : > { %v771_v13 = vand.u32 2147483647, %v4000_v33  ;;  %v913_v14 = vadd.f32 %v912_v38, %v4002_v57  ;;  %v830_v61 = vadd.f32 %v829_v21, %v4004_v25  ;;  %v851_v45 = vadd.f32 %v850_v50, %v4005_v10  ;;  %v4016_v21 = vld [vmem:[#allocation93_spill] sm:$0xff] }
 0x158   : > { %v872_v20 = vadd.f32 %v871_v40, %v4006_v55  ;;  %v816_v32 = vrot.slane %v815_v36, 2  ;;  %v893_v30 = vadd.f32 %v892_v48, %v4007_v5  ;;  %v934_v63 = vadd.f32 %v933_v7, %v4008_v44  ;;  %v4018_v40 = vld [vmem:[#allocation85_spill] sm:$0xff] }
 0x159   : > { %v914_v53 = vadd.f32 %v913_v14, %v2986_v23  ;;  %v4009_v2 = vsub.f32 %v2896_v24, %v2932_v11  ;;  %v831_v31 = vadd.f32 %v830_v61, %v2999_v8  ;;  %v852_v18 = vadd.f32 %v851_v45, %v4010_v16 }
 0x15a   : > { %v873_v6 = vadd.f32 %v872_v20, %v3009_v49  ;;  %v4012_v59 = vsub.f32 %v2929_v12, %v4011_v15  ;;  %v894_v38 = vadd.f32 %v893_v30, %v4013_v60  ;;  %v935_v42 = vadd.f32 %v934_v63, %v4014_v35  ;;  %v4015_v12 = vld [vmem:[#allocation92_spill] sm:$0xff] }
 0x15b   : > { %v772_v54 = vand.u32 2147483647, %v4009_v2  ;;  %v915_v23 = vadd.f32 %v914_v53, %v3021_v19  ;;  %v795_v26 = vrot.slane %v794_v3, 2  ;;  %v832_v24 = vadd.f32 %v831_v31, %v3037_v27 }
 0x15c   : > { %v773_v29 = vand.u32 2147483647, %v4012_v59  ;;  %v853_v11 = vadd.f32 %v852_v18, %v3044_v39  ;;  %v874_v8 = vadd.f32 %v873_v6, %v3049_v28  ;;  %v817_v47 = vadd.f32 %v816_v32, %v815_v36  ;;  %v4020_v36 = vld [vmem:[#allocation77_spill] sm:$0xff] }
 0x15d   : > { %v895_v49 = vadd.f32 %v894_v38, %v3054_v56  ;;  %v916_v58 = vadd.f32 %v915_v23, %v3059_v51  ;;  %v936_v62 = vadd.f32 %v935_v42, %v4015_v12  ;;  %v833_v46 = vadd.f32 %v832_v24, %v4016_v21 }
 0x15e   : > { %v854_v19 = vadd.f32 %v853_v11, %v3090_v9  ;;  %v875_v50 = vadd.f32 %v874_v8, %v3111_v17  ;;  %v4019_v27 = vsub.f32 %v4017_v22, %v4018_v40  ;;  %v796_v33 = vadd.f32 %v795_v26, %v794_v3  ;;  %v775_v11 = vld [vmem:[%s1539_s18] ss:$8 sm:$0xf] }
 0x15f   : > { %v896_v39 = vadd.f32 %v895_v49, %v3131_v1  ;;  %v917_v28 = vadd.f32 %v916_v58, %v3139_v37  ;;  %v937_v56 = vadd.f32 %v936_v62, %v4020_v36  ;;  %v834_v51 = vadd.f32 %v833_v46, %v769_v4  ;;  %v776_v46 = vld [vmem:[%s1539_s18] ss:$8 sm:$0xf0] }
 0x160   : > { %v774_v43 = vand.u32 2147483647, %v4019_v27  ;;  %v855_v0 = vadd.f32 %v854_v19, %v770_v52  ;;  %v876_v48 = vadd.f32 %v875_v50, %v771_v13  ;;  %v818_v57 = vrot.slane %v817_v47, 1 }
 0x161   : > { %v897_v14 = vadd.f32 %v896_v39, %v772_v54  ;;  %v918_v34 = vadd.f32 %v917_v28, %v773_v29  ;;  %v938_v9 = vadd.f32 %v937_v56, %v766_v41  ;;  %v835_v7 = vrot.slane %v834_v51, 4 }
 0x162   : > { %v856_v17 = vrot.slane %v855_v0, 4  ;;  %v877_v25 = vrot.slane %v876_v48, 4  ;;  %v797_v55 = vrot.slane %v796_v33, 1  ;;  %v819_v32 = vadd.f32 %v818_v57, %v817_v47 }
 0x163   : > { %v898_v61 = vrot.slane %v897_v14, 4  ;;  %v919_v10 = vrot.slane %v918_v34, 4  ;;  %v939_v45 = vadd.f32 %v938_v9, %v774_v43  ;;  %v836_v1 = vadd.f32 %v835_v7, %v834_v51 }
 0x164   : > { %v857_v20 = vadd.f32 %v856_v17, %v855_v0  ;;  %v878_v37 = vadd.f32 %v877_v25, %v876_v48  ;;  %v798_v63 = vadd.f32 %v797_v55, %v796_v33  ;;  %v954_v15 = vrot.slane %v819_v32, 7 }
 0x165   : > { %v899_v5 = vadd.f32 %v898_v61, %v897_v14  ;;  %v920_v3 = vadd.f32 %v919_v10, %v918_v34  ;;  %v940_v4 = vrot.slane %v939_v45, 4  ;;  %v837_v52 = vrot.slane %v836_v1, 2 }
 0x166   : > { %v858_v13 = vrot.slane %v857_v20, 2  ;;  %v879_v30 = vrot.slane %v878_v37, 2  ;;  %v962_v58 = vsel %vm961_vm0, %v798_v63, %v954_v15  ;;  %v777_v39 = vor.u32 %v776_v46, %v775_v11 }
 0x167   : > { %v900_v53 = vrot.slane %v899_v5, 2  ;;  %v921_v44 = vrot.slane %v920_v3, 2  ;;  %v941_v41 = vadd.f32 %v940_v4, %v939_v45  ;;  %v838_v2 = vadd.f32 %v837_v52, %v836_v1 }
 0x168   : > { %v859_v54 = vadd.f32 %v858_v13, %v857_v20  ;;  %v880_v31 = vadd.f32 %v879_v30, %v878_v37 }
 0x169   : > { %v901_v16 = vadd.f32 %v900_v53, %v899_v5  ;;  %v922_v18 = vadd.f32 %v921_v44, %v920_v3  ;;  %v942_v6 = vrot.slane %v941_v41, 2  ;;  %v839_v59 = vrot.slane %v838_v2, 1 }
 0x16a   : > { %v860_v29 = vrot.slane %v859_v54, 1  ;;  %v881_v60 = vrot.slane %v880_v31, 1 }
 0x16b   : > { %v902_v38 = vrot.slane %v901_v16, 1  ;;  %v923_v23 = vrot.slane %v922_v18, 1  ;;  %v943_v35 = vadd.f32 %v942_v6, %v941_v41  ;;  %v840_v42 = vadd.f32 %v839_v59, %v838_v2 }
 0x16c   : > { %v861_v26 = vadd.f32 %v860_v29, %v859_v54  ;;  %v882_v24 = vadd.f32 %v881_v60, %v880_v31 }
 0x16d   : > { %v903_v8 = vadd.f32 %v902_v38, %v901_v16  ;;  %v924_v47 = vadd.f32 %v923_v23, %v922_v18  ;;  %v944_v49 = vrot.slane %v943_v35, 1  ;;  %v955_v12 = vrot.slane %v840_v42, 6 }
 0x16e   : > { %v956_v62 = vrot.slane %v861_v26, 5  ;;  %v957_v21 = vrot.slane %v882_v24, 4 }
 0x16f   : > { %v945_v19 = vadd.f32 %v944_v49, %v943_v35  ;;  %v958_v50 = vrot.slane %v903_v8, 3  ;;  %v959_v22 = vrot.slane %v924_v47, 2 }
 0x170   : > { %v964_v40 = vsel %vm963_vm1, %v955_v12, %v956_v62 }
 0x171   : > { %v960_v27 = vrot.slane %v945_v19, 1  ;;  %v968_v43 = vsel %vm967_vm2, %v957_v21, %v958_v50  ;;  %v966_v28 = vsel %vm965_vm3, %v962_v58, %v964_v40 }
 0x173   : > { %v970_v36 = vsel %vm969_vm4, %v959_v22, %v960_v27 }
 0x174   : > { %v972_v56 = vsel %vm971_vm5, %v968_v43, %v970_v36 }
 0x175   : > { %v974_v33 = vsel %vm973_vm6, %v966_v28, %v972_v56 }
 0x176   : > { %v976_v51 = vadd.f32 %v974_v33, %v777_v39 }
 0x178   : > { %977 = vst [vmem:[%s1539_s18] ss:$8 sm:$0xf] %v976_v51 }
 0x179   : > { %978 = vst [vmem:[%s1539_s18] ss:$8 sm:$0xf0] %v976_v51 }
 0x17a PF: > { %s1123_s21 = sshll.u32 %s1377_s14, 6  ;;  %s993_s6 = sshll.u32 %s1539_s18, 4  ;;  %s994_s6 = int_to_ptr.vmem [resolvable:$true] %s993_s6 }
 0x17b   : > { %s991_s30 = scalar_lea.hbm %s3264_s2, %s1123_s21  ;;  %s980_s3 = scalar_lea.sflag [#allocation4], %s235_s4 }
 0x17c   : > { %s995_s29 = sshll.u32 %s991_s30, 4  ;;  %s1298_s14 = scalar_lea.hbm %s3264_s2, 128  ;;  %s996_s29 = int_to_ptr.hbm [resolvable:$true] %s995_s29 }
 0x17d   : > { %s1292_s7 = sshra.s32 %s996_s29, 4  ;;  %s1293_s7 = int_to_ptr.hbm [resolvable:$true] %s1292_s7 }
 0x17e   : > { %s1294_s8 = scalar_lea.hbm %s1293_s7, 64  ;;  %p1299_p11 = scmp.lt.s32.totalorder %s1293_s7, %s3264_s2 }
 0x17f   : > { %p1295_p2 = scmp.ne.s32.totalorder %s1293_s7, %s1294_s8  ;;  %p1300_p1 = scmp.lt.s32.totalorder %s1298_s14, %s1294_s8 }
 0x181   : > { %p1296_p8 = pnand %p1295_p2, %p1471_p12  ;;  %p1301_p7 = por %p1300_p1, %p1299_p11 }
 0x183   : > { %p1297_p4 = pneg %p1296_p8 }
 0x185   : > { %p1302_p9 = pnand %p1301_p7, %p1297_p4 }
 0x187   : > { %1305 = shalt.err (!%p1302_p9)
}
 0x188   : > { %1128 = dma.vmem_to_hbm [thread:$0]  (%p1471_p12), %s994_s6, 1024, %s996_s29, %s980_s3  }
 0x189 PF: > { %s1007_s5 = sand.u32 1, %s1357_s9   ;;  %p1138_p10 = pnand %p1100_p13, %p1476_p0 }
 0x18a   : > { %s1008_s4 = scalar_lea.sflag [#allocation4], %s1007_s5 }
 0x18b   : > { %p1139_p3 = pneg %p1138_p10 }
 0x18d   : > { %1351 = dma.done.wait (%p1139_p3), %s1008_s4, 1024  }
 0x18e   : > { %1353 = vsyncadd (%p1139_p3), %s1008_s4, 4294966272  ;;  %s21_s16 = sadd.s32 1, %s1385_s16   ;;  %s4021_s9 = smov %s1361_s10 }
 0x18f   : > { %p18_p5 = scmp.ge.s32.totalorder %s21_s16, 4   ;;  %s4022_s10 = smov %s1365_s11 }
 0x190   : > { %s4023_s11 = smov %s1465_s24  ;;  %s4024_s12 = smov %s1373_s13 }
 0x191   : > { %s3252_s13 = smov 0   ;;  %s4025_s14 = smov %s1381_s15 }
 0x192   : > { %s4026_s15 = smov %s4028_s19  ;;  %20 = sbr.rel (!%p18_p5) target bundleno = 9 (0x9), region = 94 }
 0x197   :  { %1014 = vsyncpa [#allocation3], 1 }
 0x198   :  { %1016 = vsyncpa [#allocation3 + $0x1], 1 }
 0x199   :  { %1017 = vsyncpa [#allocation6], 1 }
 0x19a   :  { %1019 = vsyncpa [#allocation6 + $0x1], 1 }
 0x19b   :  { %1020 = vsyncpa [#allocation4], 1 }
 0x19c   :  { %1022 = vsyncpa [#allocation4 + $0x1], 1 }

</bundles_post_ra>
